<compile_context>
chip_gen: v7x
topology: tpu7x:2x2x1
jax: 0.10.0
libtpu: 0.0.40
codegen_flags: <defaults>
</compile_context>

<pallas_src>
import jax
import jax.numpy as jnp
from jax import lax
from jax.experimental import pallas as pl
from jax.experimental.pallas import tpu as pltpu

# Model hyper-parameters (mirrors CNNModel.__init__)
EMB_DIM = 300
KERNEL_NUMS = 128
KERNEL_SIZES = (3, 4, 5)
LABEL_SIZE = 5              # small label_size for the synthetic example
OUT_PAD = 128               # logits padded to a full lane width
BATCH = 2
SEQ_LEN = 16


def _cnn_kernel(x_ref, w_ref, bconv_ref, wfc_ref, bfc_ref, out_ref):
    B, L, D = x_ref.shape
    BL = B * L
    C = KERNEL_NUMS

    # Merge batch/time (pure view: L is a multiple of the sublane tile) and
    # cast to bf16 in-kernel; one fused 2-D MXU matmul for all 12 conv taps.
    x2d = x_ref[...].reshape(BL, D).astype(jnp.bfloat16)          # (B*L, 300)
    taps = jnp.dot(x2d, w_ref[...],
                   preferred_element_type=jnp.float32)            # (B*L, 1536) f32

    # Time index used to mask the invalid tail rows of each conv branch.
    t_idx = lax.broadcasted_iota(jnp.int32, (B, L, C), 1)

    feats = []
    col = 0
    for bi, K in enumerate(KERNEL_SIZES):
        T = L - K + 1
        # Align tap k onto output position t via a full-vreg sublane rotation
        # (lane slices are 128-aligned; no sublane-offset slicing).  The
        # circular wrap / cross-batch rows only land in t >= T, masked below.
        acc = taps[:, col:col + C]
        for k in range(1, K):
            blk = taps[:, col + k * C: col + (k + 1) * C]
            acc = acc + pltpu.roll(blk, shift=BL - k, axis=0)      # == roll by -k
        col += K * C

        acc3 = acc.reshape(B, L, C)
        acc3 = jnp.where(t_idx < T, acc3, -jnp.inf)
        # max-over-time first, then per-channel bias + ReLU (exactly equal to
        # ReLU(conv + bias) -> maxpool, since bias is per-channel and ReLU is
        # monotone) -> (B, C).
        pooled = jnp.max(acc3, axis=1) + bconv_ref[:, bi * C:(bi + 1) * C]
        feats.append(jnp.maximum(pooled, 0.0))

    h = jnp.concatenate(feats, axis=-1).astype(jnp.bfloat16)       # (B, 3*C)
    # TODO(synk): nn.Dropout is identity in eval mode; no RNG dropout applied.
    logits = jnp.dot(h, wfc_ref[...],
                     preferred_element_type=jnp.float32) + bfc_ref[...]
    out_ref[...] = logits.astype(out_ref.dtype)                    # (B, 128) lane-dense


def cnn_forward(x_nchw, packed_params):
    """x_nchw: (B, 1, L, D) float32, matching the PyTorch forward() input."""
    x = jnp.squeeze(x_nchw, axis=1)                                # (B, L, D)
    B, L, D = x.shape
    w_all, b_all, wfc_p, bfc_p = packed_params

    n_taps = sum(KERNEL_SIZES) * KERNEL_NUMS
    flops = 2 * B * L * D * n_taps + 2 * B * (3 * KERNEL_NUMS) * OUT_PAD
    bytes_accessed = (x.size * 4 + w_all.size * 2 + b_all.size * 4
                      + wfc_p.size * 2 + bfc_p.size * 4 + B * OUT_PAD * 4)

    vmem = pl.BlockSpec(memory_space=pltpu.MemorySpace.VMEM)
    logits_p = pl.pallas_call(
        _cnn_kernel,
        out_shape=jax.ShapeDtypeStruct((B, OUT_PAD), jnp.float32),
        in_specs=[vmem] * 5,
        out_specs=vmem,
        cost_estimate=pl.CostEstimate(flops=flops, transcendentals=0,
                                      bytes_accessed=bytes_accessed),
    )(x, w_all, b_all, wfc_p, bfc_p)
    return logits_p[:, :LABEL_SIZE]                                # strip output padding


def init_params(key):
    """Raw parameters, matching CNNModel.init_weight() distributions."""
    keys = jax.random.split(key, 4)
    conv_ws, conv_bs = [], []
    for i, K in enumerate(KERNEL_SIZES):
        # PyTorch conv.weight is (C, 1, K, D); stored here as (K, D, C).
        w = 0.1 * jax.random.normal(keys[i], (K, EMB_DIM, KERNEL_NUMS), jnp.float32)
        conv_ws.append(w)
        conv_bs.append(jnp.full((KERNEL_NUMS,), 0.1, jnp.float32))
    fan_in = len(KERNEL_SIZES) * KERNEL_NUMS
    limit = (6.0 / (fan_in + LABEL_SIZE)) ** 0.5                   # xavier_uniform
    # PyTorch fc.weight is (label, fan_in); stored transposed (fan_in, label).
    wfc = jax.random.uniform(keys[3], (fan_in, LABEL_SIZE), jnp.float32,
                             -limit, limit)
    bfc = jnp.full((LABEL_SIZE,), 0.1, jnp.float32)
    return conv_ws, conv_bs, wfc, bfc


def pack_params(conv_ws, conv_bs, wfc, bfc):
    """Pack weights into the fused, MXU-friendly (bf16) layout."""
    cols = []
    for w in conv_ws:
        K = w.shape[0]
        # (K, D, C) -> (D, K, C) -> (D, K*C): column k*C + c == tap k, channel c.
        cols.append(w.transpose(1, 0, 2).reshape(EMB_DIM, K * KERNEL_NUMS))
    w_all = jnp.concatenate(cols, axis=1).astype(jnp.bfloat16)     # (300, 1536) bf16
    b_all = jnp.concatenate(conv_bs)[None, :]                      # (1, 3*C) f32
    wfc_p = jnp.pad(wfc, ((0, 0), (0, OUT_PAD - LABEL_SIZE))
                    ).astype(jnp.bfloat16)                         # (3*C, 128) bf16
    bfc_p = jnp.pad(bfc, (0, OUT_PAD - LABEL_SIZE))[None, :]       # (1, 128) f32
    return w_all, b_all, wfc_p, bfc_p


def reference_forward_f32(x_nchw, conv_ws, conv_bs, wfc, bfc):
    """Pure-JAX f32 reference of the PyTorch forward (eval-mode dropout)."""
    x = jnp.squeeze(x_nchw, axis=1)
    feats = []
    for w, b in zip(conv_ws, conv_bs):
        K = w.shape[0]
        T = x.shape[1] - K + 1
        acc = sum(jnp.einsum('btd,dc->btc', x[:, k:k + T, :], w[k])
                  for k in range(K))
        acc = jax.nn.relu(acc + b[None, None, :])
        feats.append(jnp.max(acc, axis=1))
    h = jnp.concatenate(feats, axis=-1)
    return h @ wfc + bfc[None, :]


def reference_forward_bf16(x_nchw, conv_ws, conv_bs, wfc, bfc):
    """Reference using the same bf16-operand / f32-accumulate compute path."""
    x = jnp.squeeze(x_nchw, axis=1).astype(jnp.bfloat16)
    feats = []
    for w, b in zip(conv_ws, conv_bs):
        K = w.shape[0]
        T = x.shape[1] - K + 1
        wb = w.astype(jnp.bfloat16)
        acc = sum(jnp.einsum('btd,dc->btc', x[:, k:k + T, :], wb[k],
                             preferred_element_type=jnp.float32)
                  for k in range(K))
        feats.append(jax.nn.relu(jnp.max(acc, axis=1) + b[None, :]))
    h = jnp.concatenate(feats, axis=-1).astype(jnp.bfloat16)
    logits = jnp.dot(h, wfc.astype(jnp.bfloat16),
                     preferred_element_type=jnp.float32)
    return logits + bfc[None, :]


if __name__ == "__main__":
    key = jax.random.PRNGKey(0)
    k_x, k_p = jax.random.split(key)
    # forward() expects the already-embedded, channel-unsqueezed tensor (B,1,L,D).
    x = jax.random.normal(k_x, (BATCH, 1, SEQ_LEN, EMB_DIM), jnp.float32)
    conv_ws, conv_bs, wfc, bfc = init_params(k_p)
    packed = pack_params(conv_ws, conv_bs, wfc, bfc)

    logits = cnn_forward(x, packed)
    jax.block_until_ready(logits)
    assert logits.shape == (BATCH, LABEL_SIZE)

    # Tight check against a reference that uses the same bf16 MXU operands.
    ref_bf16 = reference_forward_bf16(x, conv_ws, conv_bs, wfc, bfc)
    assert jnp.allclose(logits, ref_bf16, atol=2e-3, rtol=2e-3), \
        "mismatch vs matched bf16 reference"

    # Looser check against the exact f32 PyTorch-semantics reference
    # (difference comes only from bf16 quantization of the MXU operands).
    ref_f32 = reference_forward_f32(x, conv_ws, conv_bs, wfc, bfc)
    assert jnp.allclose(logits, ref_f32, atol=1e-1, rtol=5e-2), \
        "mismatch vs f32 reference"

    print("KERNEL_OK")
</pallas_src>

<mosaic_0001>
module attributes {stable_mosaic.version = 11 : i64} {
  func.func @_cnn_kernel(%arg0: memref<2x16x300xf32, #tpu.memory_space<vmem>>, %arg1: memref<300x1536xbf16, #tpu.memory_space<vmem>>, %arg2: memref<1x384xf32, #tpu.memory_space<vmem>>, %arg3: memref<384x128xbf16, #tpu.memory_space<vmem>>, %arg4: memref<1x128xf32, #tpu.memory_space<vmem>>, %arg5: memref<2x128xf32, #tpu.memory_space<vmem>>) attributes {dimension_semantics = [], scalar_prefetch = 0 : i64, scratch_operands = 0 : i64, tpu.core_type = #tpu.core_type<tc>} {
    %c0 = arith.constant 0 : index
    %c0_0 = arith.constant 0 : index
    %c0_1 = arith.constant 0 : index
    %0 = vector.load %arg0[%c0, %c0_0, %c0_1] : memref<2x16x300xf32, #tpu.memory_space<vmem>>, vector<2x16x300xf32>
    %1 = vector.shape_cast %0 : vector<2x16x300xf32> to vector<32x300xf32>
    %2 = arith.truncf %1 : vector<32x300xf32> to vector<32x300xbf16>
    %c0_2 = arith.constant 0 : index
    %c0_3 = arith.constant 0 : index
    %3 = vector.load %arg1[%c0_2, %c0_3] : memref<300x1536xbf16, #tpu.memory_space<vmem>>, vector<300x1536xbf16>
    %cst = arith.constant dense<0.000000e+00> : vector<32x1536xf32>
    %4 = tpu.matmul %2, %3, %cst {dimension_numbers = #tpu.dot_dimension_numbers<[1], [0], [0], [1], [0, 0, 1, 1], [], []>} : vector<32x300xbf16>, vector<300x1536xbf16>, vector<32x1536xf32> -> vector<32x1536xf32>
    %5 = tpu.iota {dimensions = array<i32: 1>} : vector<2x16x128xi32>
    %6 = vector.extract_strided_slice %4 {offsets = [0, 0], sizes = [32, 128], strides = [1, 1]} : vector<32x1536xf32> to vector<32x128xf32>
    %7 = vector.extract_strided_slice %4 {offsets = [0, 128], sizes = [32, 128], strides = [1, 1]} : vector<32x1536xf32> to vector<32x128xf32>
    %c31_i32 = arith.constant 31 : i32
    %8 = tpu.dynamic_rotate %7 by %c31_i32 dim 0 : vector<32x128xf32>, i32 -> vector<32x128xf32>
    %9 = arith.addf %6, %8 : vector<32x128xf32>
    %10 = vector.extract_strided_slice %4 {offsets = [0, 256], sizes = [32, 128], strides = [1, 1]} : vector<32x1536xf32> to vector<32x128xf32>
    %c30_i32 = arith.constant 30 : i32
    %11 = tpu.dynamic_rotate %10 by %c30_i32 dim 0 : vector<32x128xf32>, i32 -> vector<32x128xf32>
    %12 = arith.addf %9, %11 : vector<32x128xf32>
    %13 = vector.shape_cast %12 : vector<32x128xf32> to vector<2x16x128xf32>
    %c14_i32 = arith.constant 14 : i32
    %14 = vector.broadcast %c14_i32 : i32 to vector<2x16x128xi32>
    %15 = arith.cmpi slt, %5, %14 : vector<2x16x128xi32>
    %cst_4 = arith.constant 0xFF800000 : f32
    %16 = vector.broadcast %cst_4 : f32 to vector<2x16x128xf32>
    %17 = arith.select %15, %13, %16 : vector<2x16x128xi1>, vector<2x16x128xf32>
    %cst_5 = arith.constant dense<0xFF800000> : vector<2x128xf32>
    %18 = vector.multi_reduction <maximumf>, %17, %cst_5 [1] : vector<2x16x128xf32> to vector<2x128xf32>
    %c0_6 = arith.constant 0 : index
    %c0_7 = arith.constant 0 : index
    %19 = vector.load %arg2[%c0_6, %c0_7] : memref<1x384xf32, #tpu.memory_space<vmem>>, vector<1x128xf32>
    %20 = vector.broadcast %19 : vector<1x128xf32> to vector<2x128xf32>
    %21 = arith.addf %18, %20 : vector<2x128xf32>
    %cst_8 = arith.constant 0.000000e+00 : f32
    %22 = vector.broadcast %cst_8 : f32 to vector<2x128xf32>
    %23 = arith.maximumf %21, %22 : vector<2x128xf32>
    %24 = vector.extract_strided_slice %4 {offsets = [0, 384], sizes = [32, 128], strides = [1, 1]} : vector<32x1536xf32> to vector<32x128xf32>
    %25 = vector.extract_strided_slice %4 {offsets = [0, 512], sizes = [32, 128], strides = [1, 1]} : vector<32x1536xf32> to vector<32x128xf32>
    %c31_i32_9 = arith.constant 31 : i32
    %26 = tpu.dynamic_rotate %25 by %c31_i32_9 dim 0 : vector<32x128xf32>, i32 -> vector<32x128xf32>
    %27 = arith.addf %24, %26 : vector<32x128xf32>
    %28 = vector.extract_strided_slice %4 {offsets = [0, 640], sizes = [32, 128], strides = [1, 1]} : vector<32x1536xf32> to vector<32x128xf32>
    %c30_i32_10 = arith.constant 30 : i32
    %29 = tpu.dynamic_rotate %28 by %c30_i32_10 dim 0 : vector<32x128xf32>, i32 -> vector<32x128xf32>
    %30 = arith.addf %27, %29 : vector<32x128xf32>
    %31 = vector.extract_strided_slice %4 {offsets = [0, 768], sizes = [32, 128], strides = [1, 1]} : vector<32x1536xf32> to vector<32x128xf32>
    %c29_i32 = arith.constant 29 : i32
    %32 = tpu.dynamic_rotate %31 by %c29_i32 dim 0 : vector<32x128xf32>, i32 -> vector<32x128xf32>
    %33 = arith.addf %30, %32 : vector<32x128xf32>
    %34 = vector.shape_cast %33 : vector<32x128xf32> to vector<2x16x128xf32>
    %c13_i32 = arith.constant 13 : i32
    %35 = vector.broadcast %c13_i32 : i32 to vector<2x16x128xi32>
    %36 = arith.cmpi slt, %5, %35 : vector<2x16x128xi32>
    %cst_11 = arith.constant 0xFF800000 : f32
    %37 = vector.broadcast %cst_11 : f32 to vector<2x16x128xf32>
    %38 = arith.select %36, %34, %37 : vector<2x16x128xi1>, vector<2x16x128xf32>
    %cst_12 = arith.constant dense<0xFF800000> : vector<2x128xf32>
    %39 = vector.multi_reduction <maximumf>, %38, %cst_12 [1] : vector<2x16x128xf32> to vector<2x128xf32>
    %c0_13 = arith.constant 0 : index
    %c128 = arith.constant 128 : index
    %40 = vector.load %arg2[%c0_13, %c128] : memref<1x384xf32, #tpu.memory_space<vmem>>, vector<1x128xf32>
    %41 = vector.broadcast %40 : vector<1x128xf32> to vector<2x128xf32>
    %42 = arith.addf %39, %41 : vector<2x128xf32>
    %cst_14 = arith.constant 0.000000e+00 : f32
    %43 = vector.broadcast %cst_14 : f32 to vector<2x128xf32>
    %44 = arith.maximumf %42, %43 : vector<2x128xf32>
    %45 = vector.extract_strided_slice %4 {offsets = [0, 896], sizes = [32, 128], strides = [1, 1]} : vector<32x1536xf32> to vector<32x128xf32>
    %46 = vector.extract_strided_slice %4 {offsets = [0, 1024], sizes = [32, 128], strides = [1, 1]} : vector<32x1536xf32> to vector<32x128xf32>
    %c31_i32_15 = arith.constant 31 : i32
    %47 = tpu.dynamic_rotate %46 by %c31_i32_15 dim 0 : vector<32x128xf32>, i32 -> vector<32x128xf32>
    %48 = arith.addf %45, %47 : vector<32x128xf32>
    %49 = vector.extract_strided_slice %4 {offsets = [0, 1152], sizes = [32, 128], strides = [1, 1]} : vector<32x1536xf32> to vector<32x128xf32>
    %c30_i32_16 = arith.constant 30 : i32
    %50 = tpu.dynamic_rotate %49 by %c30_i32_16 dim 0 : vector<32x128xf32>, i32 -> vector<32x128xf32>
    %51 = arith.addf %48, %50 : vector<32x128xf32>
    %52 = vector.extract_strided_slice %4 {offsets = [0, 1280], sizes = [32, 128], strides = [1, 1]} : vector<32x1536xf32> to vector<32x128xf32>
    %c29_i32_17 = arith.constant 29 : i32
    %53 = tpu.dynamic_rotate %52 by %c29_i32_17 dim 0 : vector<32x128xf32>, i32 -> vector<32x128xf32>
    %54 = arith.addf %51, %53 : vector<32x128xf32>
    %55 = vector.extract_strided_slice %4 {offsets = [0, 1408], sizes = [32, 128], strides = [1, 1]} : vector<32x1536xf32> to vector<32x128xf32>
    %c28_i32 = arith.constant 28 : i32
    %56 = tpu.dynamic_rotate %55 by %c28_i32 dim 0 : vector<32x128xf32>, i32 -> vector<32x128xf32>
    %57 = arith.addf %54, %56 : vector<32x128xf32>
    %58 = vector.shape_cast %57 : vector<32x128xf32> to vector<2x16x128xf32>
    %c12_i32 = arith.constant 12 : i32
    %59 = vector.broadcast %c12_i32 : i32 to vector<2x16x128xi32>
    %60 = arith.cmpi slt, %5, %59 : vector<2x16x128xi32>
    %cst_18 = arith.constant 0xFF800000 : f32
    %61 = vector.broadcast %cst_18 : f32 to vector<2x16x128xf32>
    %62 = arith.select %60, %58, %61 : vector<2x16x128xi1>, vector<2x16x128xf32>
    %cst_19 = arith.constant dense<0xFF800000> : vector<2x128xf32>
    %63 = vector.multi_reduction <maximumf>, %62, %cst_19 [1] : vector<2x16x128xf32> to vector<2x128xf32>
    %c0_20 = arith.constant 0 : index
    %c256 = arith.constant 256 : index
    %64 = vector.load %arg2[%c0_20, %c256] : memref<1x384xf32, #tpu.memory_space<vmem>>, vector<1x128xf32>
    %65 = vector.broadcast %64 : vector<1x128xf32> to vector<2x128xf32>
    %66 = arith.addf %63, %65 : vector<2x128xf32>
    %cst_21 = arith.constant 0.000000e+00 : f32
    %67 = vector.broadcast %cst_21 : f32 to vector<2x128xf32>
    %68 = arith.maximumf %66, %67 : vector<2x128xf32>
    %69 = tpu.concatenate %23, %44, %68 in 1 : vector<2x128xf32>, vector<2x128xf32>, vector<2x128xf32> -> vector<2x384xf32>
    %70 = arith.truncf %69 : vector<2x384xf32> to vector<2x384xbf16>
    %c0_22 = arith.constant 0 : index
    %c0_23 = arith.constant 0 : index
    %71 = vector.load %arg3[%c0_22, %c0_23] : memref<384x128xbf16, #tpu.memory_space<vmem>>, vector<384x128xbf16>
    %cst_24 = arith.constant dense<0.000000e+00> : vector<2x128xf32>
    %72 = tpu.matmul %70, %71, %cst_24 {dimension_numbers = #tpu.dot_dimension_numbers<[1], [0], [0], [1], [0, 0, 1, 1], [], []>} : vector<2x384xbf16>, vector<384x128xbf16>, vector<2x128xf32> -> vector<2x128xf32>
    %c0_25 = arith.constant 0 : index
    %c0_26 = arith.constant 0 : index
    %73 = vector.load %arg4[%c0_25, %c0_26] : memref<1x128xf32, #tpu.memory_space<vmem>>, vector<1x128xf32>
    %74 = vector.broadcast %73 : vector<1x128xf32> to vector<2x128xf32>
    %75 = arith.addf %72, %74 : vector<2x128xf32>
    %c0_27 = arith.constant 0 : index
    %c0_28 = arith.constant 0 : index
    %76 = vector.load %arg5[%c0_27, %c0_28] : memref<2x128xf32, #tpu.memory_space<vmem>>, vector<2x128xf32>
    tpu.vector_store %arg5[%c0_27, %c0_28], %75 {strides = array<i32>} : memref<2x128xf32, #tpu.memory_space<vmem>>, vector<2x128xf32>,
    return
  }
}

</mosaic_0001>

<bundles_post_ra>
// kernel: tpu_custom_call.1
= control target key start
LH: loop header
LB: loop body
LE: loop exit
PB: predicated region body
PF: predicated region fallthrough
CT: control target
= control target key end

     0   :  { %10 = vsyncpa [#allocation3], 0  ;;  %s3788_s0 = inlined_call_operand.hbm [shape: f32[2,16,300], index: 0, kind: input, shape index: {}]   ;;  %s3789_s1 = inlined_call_operand.hbm [shape: bf16[300,1536], index: 1, kind: input, shape index: {}]   ;;  %s3790_s2 = inlined_call_operand.vmem [shape: f32[1,384], index: 2, kind: input, shape index: {}]   ;;  %s3791_s3 = inlined_call_operand.hbm [shape: bf16[384,128], index: 3, kind: input, shape index: {}]   ;;  %s3792_s4 = inlined_call_operand.vmem [shape: f32[1,128], index: 4, kind: input, shape index: {}]   ;;  %s3793_s5 = inlined_call_operand.hbm [shape: f32[2,128], index: 5, kind: output, shape index: {}]  }
   0x1   :  { %11 = vsyncpa [#allocation6], 0 }
   0x2   :  { %12 = vsyncpa [#allocation4], 0  ;;  %s3486_s18 = smov [#allocation5]   ;;  %s3392_s22 = scalar_lea.hbm %s3789_s1, 29184 }
   0x3   :  { %s30_s19 = sshll.u32 %s3486_s18, 4  ;;  %p3393_p0 = scmp.ne.s32.totalorder %s3789_s1, %s3392_s22  ;;  %s31_s19 = int_to_ptr.vmem [resolvable:$true] %s30_s19 }
   0x4   :  { %p3396_p1 = scmp.lt.u32.totalorder %s3392_s22, %s3789_s1 }
   0x6   :  { %p3398_p2 = pnand %p3396_p1, %p3393_p0 }
   0x8   :  { %3401 = shalt.err (!%p3398_p2)
}
   0x9   :  { %s3402_s27 = scalar_lea.vmem %s31_s19, 29184  ;;  %p3407_p4 = scmp.lt.s32.totalorder %s31_s19, %s31_s19 }
   0xa   :  { %p3403_p3 = scmp.ne.s32.totalorder %s31_s19, %s3402_s27  ;;  %p3408_p5 = scmp.lt.s32.totalorder %s3402_s27, %s3402_s27 }
   0xc   :  { %p3409_p6 = por %p3408_p5, %p3407_p4 }
   0xe   :  { %p3410_p7 = pnand %p3409_p6, %p3403_p3 }
  0x10   :  { %3413 = shalt.err (!%p3410_p7)
}
  0x11   :  { %s3487_s28 = smov 768   ;;  %s3488_s29 = smov 48  }
  0x12   :  { %36 = dma.hbm_to_vmem [thread:$0]  %s3789_s1, 29184, %s31_s19, [#allocation6], %s3487_s28, %s3487_s28, %s3488_s29  }
  0x13   :  { %s3489_s7 = smov [#allocation2]   ;;  %s3414_s11 = scalar_lea.hbm %s3788_s0, 1536 }
  0x14   :  { %s18_s8 = sshll.u32 %s3489_s7, 4  ;;  %p3415_p8 = scmp.ne.s32.totalorder %s3788_s0, %s3414_s11  ;;  %s19_s8 = int_to_ptr.vmem [resolvable:$true] %s18_s8 }
  0x15   :  { %p3418_p9 = scmp.lt.u32.totalorder %s3414_s11, %s3788_s0 }
  0x17   :  { %p3420_p10 = pnand %p3418_p9, %p3415_p8 }
  0x19   :  { %3423 = shalt.err (!%p3420_p10)
}
  0x1a   :  { %s3424_s16 = scalar_lea.vmem %s19_s8, 1536  ;;  %p3429_p12 = scmp.lt.s32.totalorder %s19_s8, %s19_s8 }
  0x1b   :  { %p3425_p11 = scmp.ne.s32.totalorder %s19_s8, %s3424_s16  ;;  %p3430_p13 = scmp.lt.s32.totalorder %s3424_s16, %s3424_s16 }
  0x1d   :  { %p3431_p0 = por %p3430_p13, %p3429_p12 }
  0x1f   :  { %p3432_p1 = pnand %p3431_p0, %p3425_p11 }
  0x21   :  { %3435 = shalt.err (!%p3432_p1)
}
  0x22   :  { %s3490_s1 = smov 384   ;;  %s3491_s17 = smov 24  }
  0x23   :  { %24 = dma.hbm_to_vmem [thread:$0]  %s3788_s0, 1536, %s19_s8, [#allocation3], %s3490_s1, %s3490_s1, %s3491_s17  }
  0x24   :  { %s3492_s20 = smov [#allocation7]   ;;  %s3436_s24 = scalar_lea.hbm %s3791_s3, 3072 }
  0x25   :  { %s44_s21 = sshll.u32 %s3492_s20, 4  ;;  %p3437_p2 = scmp.ne.s32.totalorder %s3791_s3, %s3436_s24  ;;  %s45_s21 = int_to_ptr.vmem [resolvable:$true] %s44_s21 }
  0x26   :  { %p3440_p3 = scmp.lt.u32.totalorder %s3436_s24, %s3791_s3 }
  0x28   :  { %p3442_p4 = pnand %p3440_p3, %p3437_p2 }
  0x2a   :  { %3445 = shalt.err (!%p3442_p4)
}
  0x2b   :  { %s3446_s29 = scalar_lea.vmem %s45_s21, 3072  ;;  %p3451_p6 = scmp.lt.s32.totalorder %s45_s21, %s45_s21 }
  0x2c   :  { %p3447_p5 = scmp.ne.s32.totalorder %s45_s21, %s3446_s29  ;;  %p3452_p7 = scmp.lt.s32.totalorder %s3446_s29, %s3446_s29 }
  0x2e   :  { %p3453_p8 = por %p3452_p7, %p3451_p6 }
  0x30   :  { %p3454_p9 = pnand %p3453_p8, %p3447_p5 }
  0x32   :  { %3457 = shalt.err (!%p3454_p9)
}
  0x33   :  { %s3493_s0 = smov 64   ;;  %s3494_s30 = smov 4  }
  0x34   :  { %50 = dma.hbm_to_vmem [thread:$0]  %s3791_s3, 3072, %s45_s21, [#allocation6], %s3493_s0, %s3493_s0, %s3494_s30  }
  0x35   :  { %3480 = dma.done.wait [#allocation3], 1536  }
  0x36   :  { %3481 = vsyncadd [#allocation3], 4294965760 }
  0x37   :  { %3482 = dma.done.wait [#allocation6], 32256  }
  0x38   :  { %3483 = vsyncadd [#allocation6], 4294935040  ;;  %v3026_v0 = vld [vmem:[#allocation5 + $0x4] ss:$48 sps:$4 sm:$0xff]   ;;  %v3028_v1 = vld [vmem:[#allocation5 + $0xc] ss:$48 sps:$4 sm:$0xff]  }
  0x39   :  { %1481 = vmatprep.subr.bf16.mxu0 %v3026_v0  ;;  %v3030_v2 = vld [vmem:[#allocation5] ss:$48 sps:$4 sm:$0xff]   ;;  %v3031_v3 = vld [vmem:[#allocation5 + $0x8] ss:$48 sps:$4 sm:$0xff]   ;;  %1587 = vmatprep.subr.bf16.mxu1 %v3028_v1  ;;  %v3032_v4 = vld [vmem:[#allocation5 + $0x64] ss:$48 sps:$4 sm:$0xff]  }
  0x3a   :  { %1482 = vmatpush1.bf16.msra.mxu0 %v3030_v2  ;;  %1588 = vmatpush1.bf16.msra.mxu1 %v3031_v3  ;;  %v3034_v5 = vld [vmem:[#allocation5 + $0x6c] ss:$48 sps:$4 sm:$0xff]   ;;  %v3036_v6 = vld [vmem:[#allocation5 + $0x60] ss:$48 sps:$4 sm:$0xff]   ;;  %v3037_v7 = vld [vmem:[#allocation5 + $0x68] ss:$48 sps:$4 sm:$0xff]  }
  0x3b   :  { %1483 = vmatprep.subr.bf16.mxu0 %v3032_v4  ;;  %1589 = vmatprep.subr.bf16.mxu1 %v3034_v5  ;;  %v3038_v8 = vld [vmem:[#allocation5 + $0xc4] ss:$48 sps:$4 sm:$0xff]   ;;  %v3040_v9 = vld [vmem:[#allocation5 + $0xcc] ss:$48 sps:$4 sm:$0xff]   ;;  %v3042_v10 = vld [vmem:[#allocation5 + $0xc0] ss:$48 sps:$4 sm:$0xff]  }
  0x3c   :  { %v3043_v11 = vld [vmem:[#allocation5 + $0xc8] ss:$48 sps:$4 sm:$0xff]   ;;  %v3044_v12 = vld [vmem:[#allocation5 + $0x124] ss:$48 sps:$4 sm:$0xff]   ;;  %v3046_v13 = vld [vmem:[#allocation5 + $0x12c] ss:$48 sps:$4 sm:$0xff]  }
  0x3d   :  { %v3048_v14 = vld [vmem:[#allocation5 + $0x120] ss:$48 sps:$4 sm:$0xff]   ;;  %v3049_v15 = vld [vmem:[#allocation5 + $0x128] ss:$48 sps:$4 sm:$0xff]   ;;  %v3050_v16 = vld [vmem:[#allocation5 + $0x184] ss:$48 sps:$4 sm:$0xff]  }
  0x3e   :  { %1484 = vmatpush1.bf16.msra.mxu0 %v3036_v6  ;;  %1590 = vmatpush1.bf16.msra.mxu1 %v3037_v7  ;;  %v3052_v17 = vld [vmem:[#allocation5 + $0x18c] ss:$48 sps:$4 sm:$0xff]   ;;  %v3054_v18 = vld [vmem:[#allocation5 + $0x180] ss:$48 sps:$4 sm:$0xff]   ;;  %v3055_v19 = vld [vmem:[#allocation5 + $0x188] ss:$48 sps:$4 sm:$0xff]  }
  0x3f   :  { %1485 = vmatprep.subr.bf16.mxu0 %v3038_v8  ;;  %1591 = vmatprep.subr.bf16.mxu1 %v3040_v9  ;;  %v3056_v20 = vld [vmem:[#allocation5 + $0x1e4] ss:$48 sps:$4 sm:$0xff]   ;;  %v3058_v21 = vld [vmem:[#allocation5 + $0x1ec] ss:$48 sps:$4 sm:$0xff]   ;;  %v3060_v22 = vld [vmem:[#allocation5 + $0x1e0] ss:$48 sps:$4 sm:$0xff]  }
  0x40   :  { %v3061_v23 = vld [vmem:[#allocation5 + $0x1e8] ss:$48 sps:$4 sm:$0xff]   ;;  %v3062_v24 = vld [vmem:[#allocation5 + $0x244] ss:$48 sps:$4 sm:$0xff]   ;;  %v3064_v25 = vld [vmem:[#allocation5 + $0x24c] ss:$48 sps:$4 sm:$0xff]  }
  0x41   :  { %v3066_v26 = vld [vmem:[#allocation5 + $0x240] ss:$48 sps:$4 sm:$0xff]   ;;  %v3067_v27 = vld [vmem:[#allocation5 + $0x248] ss:$48 sps:$4 sm:$0xff]   ;;  %v3068_v28 = vld [vmem:[#allocation5 + $0x2a4] ss:$48 sps:$4 sm:$0xff]  }
  0x42   :  { %1486 = vmatpush1.bf16.msra.mxu0 %v3042_v10  ;;  %1592 = vmatpush1.bf16.msra.mxu1 %v3043_v11  ;;  %v3070_v29 = vld [vmem:[#allocation5 + $0x2ac] ss:$48 sps:$4 sm:$0xff]   ;;  %v3072_v30 = vld [vmem:[#allocation5 + $0x2a0] ss:$48 sps:$4 sm:$0xff]   ;;  %v3073_v31 = vld [vmem:[#allocation5 + $0x2a8] ss:$48 sps:$4 sm:$0xff]  }
  0x43   :  { %1487 = vmatprep.subr.bf16.mxu0 %v3044_v12  ;;  %1593 = vmatprep.subr.bf16.mxu1 %v3046_v13  ;;  %v3074_v32 = vld [vmem:[#allocation5 + $0x304] ss:$48 sps:$4 sm:$0xff]   ;;  %v3076_v33 = vld [vmem:[#allocation5 + $0x30c] ss:$48 sps:$4 sm:$0xff]   ;;  %v3078_v34 = vld [vmem:[#allocation5 + $0x300] ss:$48 sps:$4 sm:$0xff]  }
  0x44   :  { %v3079_v35 = vld [vmem:[#allocation5 + $0x308] ss:$48 sps:$4 sm:$0xff]   ;;  %v3080_v36 = vld [vmem:[#allocation5 + $0x364] ss:$48 sps:$4 sm:$0xff]   ;;  %v3082_v37 = vld [vmem:[#allocation5 + $0x36c] ss:$48 sps:$4 sm:$0xff]  }
  0x45   :  { %v3084_v38 = vld [vmem:[#allocation5 + $0x360] ss:$48 sps:$4 sm:$0xff]   ;;  %v3085_v39 = vld [vmem:[#allocation5 + $0x368] ss:$48 sps:$4 sm:$0xff]   ;;  %v3086_v40 = vld [vmem:[#allocation5 + $0x3c4] ss:$48 sps:$4 sm:$0xff]  }
  0x46   :  { %1488 = vmatpush1.bf16.msra.mxu0 %v3048_v14  ;;  %1594 = vmatpush1.bf16.msra.mxu1 %v3049_v15  ;;  %v3088_v41 = vld [vmem:[#allocation5 + $0x3cc] ss:$48 sps:$4 sm:$0xff]   ;;  %v3090_v42 = vld [vmem:[#allocation5 + $0x3c0] ss:$48 sps:$4 sm:$0xff]   ;;  %v3091_v43 = vld [vmem:[#allocation5 + $0x3c8] ss:$48 sps:$4 sm:$0xff]  }
  0x47   :  { %1489 = vmatprep.subr.bf16.mxu0 %v3050_v16  ;;  %1595 = vmatprep.subr.bf16.mxu1 %v3052_v17  ;;  %v3092_v44 = vld [vmem:[#allocation5 + $0x424] ss:$48 sps:$4 sm:$0xff]   ;;  %v3094_v45 = vld [vmem:[#allocation5 + $0x42c] ss:$48 sps:$4 sm:$0xff]   ;;  %v3096_v47 = vld [vmem:[#allocation5 + $0x420] ss:$48 sps:$4 sm:$0xff]  }
  0x48   :  { %v64_v46 = vld [vmem:[#allocation2 + $0x8] sm:$0xff]  ;;  %v67_v49 = vld [vmem:[#allocation2 + $0x20] sm:$0xff]  ;;  %v66_v4 = vld [vmem:[#allocation2 + $0x18] sm:$0xff]  ;;  %vm1444_vm0 = vcmask 1045504   ;;  %vm1437_vm1 = vcmask 359424   ;;  %vm2328_vm5 = vcmask 1041409  }
  0x49   :  { %v3097_v48 = vld [vmem:[#allocation5 + $0x428] ss:$48 sps:$4 sm:$0xff]   ;;  %v3098_v50 = vld [vmem:[#allocation5 + $0x484] ss:$48 sps:$4 sm:$0xff]   ;;  %v3565_v51 = vpack.c.bf16 %v67_v49, %v64_v46  ;;  %v3100_v52 = vld [vmem:[#allocation5 + $0x48c] ss:$48 sps:$4 sm:$0xff]  }
  0x4a   :  { %1490 = vmatpush1.bf16.msra.mxu0 %v3054_v18  ;;  %1596 = vmatpush1.bf16.msra.mxu1 %v3055_v19  ;;  %v3102_v53 = vld [vmem:[#allocation5 + $0x480] ss:$48 sps:$4 sm:$0xff]   ;;  %v3103_v54 = vld [vmem:[#allocation5 + $0x488] ss:$48 sps:$4 sm:$0xff]   ;;  %v3104_v55 = vld [vmem:[#allocation5 + $0x4e4] ss:$48 sps:$4 sm:$0xff]  }
  0x4b   :  { %1491 = vmatprep.subr.bf16.mxu0 %v3056_v20  ;;  %1597 = vmatprep.subr.bf16.mxu1 %v3058_v21  ;;  %v3106_v56 = vld [vmem:[#allocation5 + $0x4ec] ss:$48 sps:$4 sm:$0xff]   ;;  %v3108_v57 = vld [vmem:[#allocation5 + $0x4e0] ss:$48 sps:$4 sm:$0xff]   ;;  %v3109_v58 = vld [vmem:[#allocation5 + $0x4e8] ss:$48 sps:$4 sm:$0xff]  }
  0x4c   :  { %1513 = vmatprep.mubr.bf16.mxu0 %v3565_v51  ;;  %1619 = vmatprep.mubr.bf16.mxu1 %v3565_v51  ;;  %v3110_v59 = vld [vmem:[#allocation5 + $0x544] ss:$48 sps:$4 sm:$0xff]   ;;  %v3112_v60 = vld [vmem:[#allocation5 + $0x54c] ss:$48 sps:$4 sm:$0xff]   ;;  %v3114_v61 = vld [vmem:[#allocation5 + $0x540] ss:$48 sps:$4 sm:$0xff]  }
  0x4d   :  { %v3115_v62 = vld [vmem:[#allocation5 + $0x548] ss:$48 sps:$4 sm:$0xff]   ;;  %v3116_v63 = vld [vmem:[#allocation5 + $0x5a4] ss:$48 sps:$4 sm:$0xff]   ;;  %v3118_v0 = vld [vmem:[#allocation5 + $0x5ac] ss:$48 sps:$4 sm:$0xff]  }
  0x4e   :  { %1492 = vmatpush1.bf16.msra.mxu0 %v3060_v22  ;;  %1598 = vmatpush1.bf16.msra.mxu1 %v3061_v23  ;;  %v3120_v1 = vld [vmem:[#allocation5 + $0x5a0] ss:$48 sps:$4 sm:$0xff]   ;;  %v3121_v2 = vld [vmem:[#allocation5 + $0x5a8] ss:$48 sps:$4 sm:$0xff]   ;;  %v3124_v5 = vld [vmem:[#allocation5 + $0x604] ss:$48 sps:$4 sm:$0xff]  }
  0x4f   :  { %1493 = vmatprep.subr.bf16.mxu0 %v3062_v24  ;;  %1599 = vmatprep.subr.bf16.mxu1 %v3064_v25  ;;  %v63_v3 = vld [vmem:[#allocation2] sm:$0xff]  ;;  %v3127_v6 = vld [vmem:[#allocation5 + $0x60c] ss:$48 sps:$4 sm:$0xff]   ;;  %v73_v8 = vld [vmem:[#allocation2 + $0x50] sm:$0xff]  ;;  %vm3497_vm6 = vmmov 0  }
  0x50   :  { %v70_v7 = vld [vmem:[#allocation2 + $0x38] sm:$0xff]  ;;  %v3569_v9 = vpack.c.bf16 %v66_v4, %v63_v3  ;;  %v3122_v10 = vld [vmem:[#allocation5 + $0x600] ss:$48 sps:$4 sm:$0xff]   ;;  %v3130_v12 = vld [vmem:[#allocation5 + $0x664] ss:$48 sps:$4 sm:$0xff]  }
  0x51   :  { %v3125_v11 = vld [vmem:[#allocation5 + $0x608] ss:$48 sps:$4 sm:$0xff]   ;;  %v3571_v13 = vpack.c.bf16 %v73_v8, %v70_v7  ;;  %v3133_v14 = vld [vmem:[#allocation5 + $0x66c] ss:$48 sps:$4 sm:$0xff]   ;;  %v3128_v15 = vld [vmem:[#allocation5 + $0x660] ss:$48 sps:$4 sm:$0xff]  }
  0x52   :  { %1494 = vmatpush1.bf16.msra.mxu0 %v3066_v26  ;;  %1600 = vmatpush1.bf16.msra.mxu1 %v3067_v27  ;;  %v3131_v16 = vld [vmem:[#allocation5 + $0x668] ss:$48 sps:$4 sm:$0xff]   ;;  %v69_v17 = vld [vmem:[#allocation2 + $0x30] sm:$0xff]  ;;  %v3136_v20 = vld [vmem:[#allocation5 + $0x6cc] ss:$48 sps:$4 sm:$0x3f]  }
  0x53   :  { %1495 = vmatprep.subr.bf16.mxu0 %v3068_v28  ;;  %1601 = vmatprep.subr.bf16.mxu1 %v3070_v29  ;;  %v72_v18 = vld [vmem:[#allocation2 + $0x48] sm:$0xff]  ;;  %v3134_v19 = vld [vmem:[#allocation5 + $0x6c4] ss:$48 sps:$4 sm:$0x3f]   ;;  %v3188_v4 = vld [vmem:[#allocation5 + $0x310] ss:$48 sps:$4 sm:$0xff]  }
  0x54   :  { %v3138_v21 = vld [vmem:[#allocation5 + $0x6c0] ss:$48 sps:$4 sm:$0x3f]   ;;  %v3139_v22 = vld [vmem:[#allocation5 + $0x6c8] ss:$48 sps:$4 sm:$0x3f]   ;;  %v3577_v23 = vpack.c.bf16 %v72_v18, %v69_v17 }
  0x55   :  { %v1446_v24 = vsel %vm1444_vm0, %v3138_v21, 0  ;;  %v1452_v25 = vsel %vm1444_vm0, %v3139_v22, 0  ;;  %v3142_v26 = vld [vmem:[#allocation5 + $0x14] ss:$48 sps:$4 sm:$0xff]   ;;  %v3145_v27 = vld [vmem:[#allocation5 + $0x1c] ss:$48 sps:$4 sm:$0xff]  }
  0x56   :  { %1496 = vmatpush1.bf16.msra.mxu0 %v3072_v30  ;;  %1602 = vmatpush1.bf16.msra.mxu1 %v3073_v31  ;;  %v65_v28 = vld [vmem:[#allocation2 + $0x10] sm:$0xff]  ;;  %v68_v29 = vld [vmem:[#allocation2 + $0x28] sm:$0xff]  ;;  %v3495_v30 = vmov 0  }
  0x57   :  { %1497 = vmatprep.subr.bf16.mxu0 %v3074_v32  ;;  %1603 = vmatprep.subr.bf16.mxu1 %v3076_v33  ;;  %v3140_v31 = vld [vmem:[#allocation5 + $0x10] ss:$48 sps:$4 sm:$0xff]   ;;  %v3587_v32 = vpack.c.bf16 %v68_v29, %v65_v28  ;;  %v3143_v33 = vld [vmem:[#allocation5 + $0x18] ss:$48 sps:$4 sm:$0xff]   ;;  %v3163_v46 = vld [vmem:[#allocation5 + $0x13c] ss:$48 sps:$4 sm:$0xff]  }
  0x58   :  { %v3166_v49 = vld [vmem:[#allocation5 + $0x194] ss:$48 sps:$4 sm:$0xff]   ;;  %v3193_v3 = vld [vmem:[#allocation5 + $0x31c] ss:$48 sps:$4 sm:$0xff]   ;;  %v3194_v8 = vld [vmem:[#allocation5 + $0x370] ss:$48 sps:$4 sm:$0xff]  }
  0x59   :  { %v3199_v7 = vld [vmem:[#allocation5 + $0x37c] ss:$48 sps:$4 sm:$0xff]   ;;  %v3206_v18 = vld [vmem:[#allocation5 + $0x430] ss:$48 sps:$4 sm:$0xff]   ;;  %v3221_v28 = vld [vmem:[#allocation5 + $0x4f8] ss:$48 sps:$4 sm:$0xff]  }
  0x5a   :  { %1498 = vmatpush1.bf16.msra.mxu0 %v3078_v34  ;;  %1604 = vmatpush1.bf16.msra.mxu1 %v3079_v35  ;;  %v3148_v34 = vld [vmem:[#allocation5 + $0x74] ss:$48 sps:$4 sm:$0xff]   ;;  %v3151_v35 = vld [vmem:[#allocation5 + $0x7c] ss:$48 sps:$4 sm:$0xff]   ;;  %v3212_v22 = vld [vmem:[#allocation5 + $0x490] ss:$48 sps:$4 sm:$0xff]  }
  0x5b   :  { %1499 = vmatprep.subr.bf16.mxu0 %v3080_v36  ;;  %1605 = vmatprep.subr.bf16.mxu1 %v3082_v37  ;;  %v3146_v36 = vld [vmem:[#allocation5 + $0x70] ss:$48 sps:$4 sm:$0xff]   ;;  %v3149_v37 = vld [vmem:[#allocation5 + $0x78] ss:$48 sps:$4 sm:$0xff]   ;;  %v3211_v17 = vld [vmem:[#allocation5 + $0x43c] ss:$48 sps:$4 sm:$0xff]  }
  0x5c   :  { %v3217_v21 = vld [vmem:[#allocation5 + $0x49c] ss:$48 sps:$4 sm:$0xff]   ;;  %v3226_v29 = vld [vmem:[#allocation5 + $0x554] ss:$48 sps:$4 sm:$0xff]  }
  0x5e   :  { %1500 = vmatpush1.bf16.msra.mxu0 %v3084_v38  ;;  %1606 = vmatpush1.bf16.msra.mxu1 %v3085_v39  ;;  %v71_v38 = vld [vmem:[#allocation2 + $0x40] sm:$0xff]  ;;  %v74_v39 = vld [vmem:[#allocation2 + $0x58] sm:$0xff] }
  0x5f   :  { %1501 = vmatprep.subr.bf16.mxu0 %v3086_v40  ;;  %1607 = vmatprep.subr.bf16.mxu1 %v3088_v41  ;;  %v3154_v40 = vld [vmem:[#allocation5 + $0xd4] ss:$48 sps:$4 sm:$0xff]   ;;  %v3157_v41 = vld [vmem:[#allocation5 + $0xdc] ss:$48 sps:$4 sm:$0xff]  }
  0x62   :  { %1502 = vmatpush1.bf16.msra.mxu0 %v3090_v42  ;;  %1608 = vmatpush1.bf16.msra.mxu1 %v3091_v43  ;;  %v3152_v42 = vld [vmem:[#allocation5 + $0xd0] ss:$48 sps:$4 sm:$0xff]   ;;  %v3595_v43 = vpack.c.bf16 %v74_v39, %v71_v38  ;;  %v3233_v38 = vld [vmem:[#allocation5 + $0x5b8] ss:$48 sps:$4 sm:$0xff]   ;;  %v3238_v39 = vld [vmem:[#allocation5 + $0x614] ss:$48 sps:$4 sm:$0xff]  }
  0x63   :  { %1503 = vmatprep.subr.bf16.mxu0 %v3092_v44  ;;  %1609 = vmatprep.subr.bf16.mxu1 %v3094_v45  ;;  %v3155_v44 = vld [vmem:[#allocation5 + $0xd8] ss:$48 sps:$4 sm:$0xff]   ;;  %v3160_v45 = vld [vmem:[#allocation5 + $0x134] ss:$48 sps:$4 sm:$0xff]  }
  0x66   :  { %1504 = vmatpush1.bf16.msra.mxu0 %v3096_v47  ;;  %1610 = vmatpush1.bf16.msra.mxu1 %v3097_v48  ;;  %v3158_v47 = vld [vmem:[#allocation5 + $0x130] ss:$48 sps:$4 sm:$0xff]   ;;  %v3161_v48 = vld [vmem:[#allocation5 + $0x138] ss:$48 sps:$4 sm:$0xff]  }
  0x67   :  { %1505 = vmatprep.subr.bf16.mxu0 %v3098_v50  ;;  %1611 = vmatprep.subr.bf16.mxu1 %v3100_v52  ;;  %v3169_v50 = vld [vmem:[#allocation5 + $0x19c] ss:$48 sps:$4 sm:$0xff]   ;;  %v3164_v52 = vld [vmem:[#allocation5 + $0x190] ss:$48 sps:$4 sm:$0xff]  }
  0x6a   :  { %1506 = vmatpush1.bf16.msra.mxu0 %v3102_v53  ;;  %1612 = vmatpush1.bf16.msra.mxu1 %v3103_v54  ;;  %v3167_v53 = vld [vmem:[#allocation5 + $0x198] ss:$48 sps:$4 sm:$0xff]   ;;  %v3172_v54 = vld [vmem:[#allocation5 + $0x1f4] ss:$48 sps:$4 sm:$0xff]  }
  0x6b   :  { %1507 = vmatprep.subr.bf16.mxu0 %v3104_v55  ;;  %1613 = vmatprep.subr.bf16.mxu1 %v3106_v56  ;;  %v3175_v55 = vld [vmem:[#allocation5 + $0x1fc] ss:$48 sps:$4 sm:$0xff]   ;;  %v3170_v56 = vld [vmem:[#allocation5 + $0x1f0] ss:$48 sps:$4 sm:$0xff]  }
  0x6e   :  { %1508 = vmatpush1.bf16.msra.mxu0 %v3108_v57  ;;  %1614 = vmatpush1.bf16.msra.mxu1 %v3109_v58  ;;  %v3173_v57 = vld [vmem:[#allocation5 + $0x1f8] ss:$48 sps:$4 sm:$0xff]   ;;  %v3178_v58 = vld [vmem:[#allocation5 + $0x254] ss:$48 sps:$4 sm:$0xff]  }
  0x6f   :  { %1509 = vmatprep.subr.bf16.mxu0 %v3110_v59  ;;  %1615 = vmatprep.subr.bf16.mxu1 %v3112_v60  ;;  %v3181_v59 = vld [vmem:[#allocation5 + $0x25c] ss:$48 sps:$4 sm:$0xff]   ;;  %v3176_v60 = vld [vmem:[#allocation5 + $0x250] ss:$48 sps:$4 sm:$0xff]  }
  0x72   :  { %1510 = vmatpush1.bf16.msra.mxu0 %v3114_v61  ;;  %1616 = vmatpush1.bf16.msra.mxu1 %v3115_v62  ;;  %v3179_v61 = vld [vmem:[#allocation5 + $0x258] ss:$48 sps:$4 sm:$0xff]   ;;  %v3184_v62 = vld [vmem:[#allocation5 + $0x2b4] ss:$48 sps:$4 sm:$0xff]  }
  0x73   :  { %1511 = vmatprep.subr.bf16.mxu0 %v3116_v63  ;;  %1617 = vmatprep.subr.bf16.mxu1 %v3118_v0  ;;  %v3187_v63 = vld [vmem:[#allocation5 + $0x2bc] ss:$48 sps:$4 sm:$0xff]   ;;  %v3182_v0 = vld [vmem:[#allocation5 + $0x2b0] ss:$48 sps:$4 sm:$0xff]  }
  0x76   :  { %1512 = vmatpush1.bf16.msra.mxu0 %v3120_v1  ;;  %1618 = vmatpush1.bf16.msra.mxu1 %v3121_v2  ;;  %v3185_v1 = vld [vmem:[#allocation5 + $0x2b8] ss:$48 sps:$4 sm:$0xff]   ;;  %v3190_v2 = vld [vmem:[#allocation5 + $0x314] ss:$48 sps:$4 sm:$0xff]  }
  0x77   :  { %1534 = vmatprep.subr.bf16.mxu0 %v3124_v5  ;;  %1640 = vmatprep.subr.bf16.mxu1 %v3127_v6  ;;  %v3191_v5 = vld [vmem:[#allocation5 + $0x318] ss:$48 sps:$4 sm:$0xff]   ;;  %v3196_v6 = vld [vmem:[#allocation5 + $0x374] ss:$48 sps:$4 sm:$0xff]  }
  0x79   :  { %1514 = vmatmul.mubr.bf16.vlgmr.msra.gmra.mrb[0].mxu0 %v3569_v9  ;;  %1620 = vmatmul.mubr.bf16.vlgmr.msra.gmra.mrb[0].mxu1 %v3569_v9 }
  0x7a   :  { %1535 = vmatpush1.bf16.msra.mxu0 %v3122_v10  ;;  %1641 = vmatpush1.bf16.msra.mxu1 %v3125_v11  ;;  %v3197_v10 = vld [vmem:[#allocation5 + $0x378] ss:$48 sps:$4 sm:$0xff]   ;;  %v3202_v11 = vld [vmem:[#allocation5 + $0x3d4] ss:$48 sps:$4 sm:$0xff]  }
  0x7b   :  { %1536 = vmatprep.subr.bf16.mxu0 %v3130_v12  ;;  %1523 = vmatprep.mubr.bf16.mxu0 %v3571_v13  ;;  %v3205_v12 = vld [vmem:[#allocation5 + $0x3dc] ss:$48 sps:$4 sm:$0xff]  }
  0x7c   :  { %1629 = vmatprep.mubr.bf16.mxu1 %v3571_v13  ;;  %1642 = vmatprep.subr.bf16.mxu1 %v3133_v14  ;;  %v3200_v14 = vld [vmem:[#allocation5 + $0x3d0] ss:$48 sps:$4 sm:$0xff]  }
  0x7e   :  { %1537 = vmatpush1.bf16.msra.mxu0 %v3128_v15  ;;  %1643 = vmatpush1.bf16.msra.mxu1 %v3131_v16  ;;  %v3203_v15 = vld [vmem:[#allocation5 + $0x3d8] ss:$48 sps:$4 sm:$0xff]   ;;  %v3208_v16 = vld [vmem:[#allocation5 + $0x434] ss:$48 sps:$4 sm:$0xff]  }
  0x7f   :  { %2868 = vmatprep.subr.msk.bf16.mxu0 %vm1444_vm0, %v3134_v19  ;;  %2871 = vmatprep.subr.msk.bf16.mxu1 %vm1444_vm0, %v3136_v20  ;;  %v3209_v19 = vld [vmem:[#allocation5 + $0x438] ss:$48 sps:$4 sm:$0xff]   ;;  %v3214_v20 = vld [vmem:[#allocation5 + $0x494] ss:$48 sps:$4 sm:$0xff]  }
  0x81   :  { %1524 = vmatmul.mubr.bf16.gmra.mrb[4].mxu0 %v3577_v23  ;;  %1630 = vmatmul.mubr.bf16.gmra.mrb[4].mxu1 %v3577_v23 }
  0x82   :  { %1539 = vmatpush1.bf16.msra.mxu0 %v1446_v24  ;;  %1645 = vmatpush1.bf16.msra.mxu1 %v1452_v25  ;;  %v3215_v24 = vld [vmem:[#allocation5 + $0x498] ss:$48 sps:$4 sm:$0xff]   ;;  %v3220_v25 = vld [vmem:[#allocation5 + $0x4f4] ss:$48 sps:$4 sm:$0xff]  }
  0x83   :  { %1566 = vmatprep.mubr.bf16.mxu0 %v3495_v30  ;;  %1672 = vmatprep.mubr.bf16.mxu1 %v3495_v30 }
  0x84   :  { %1693 = vmatprep.subr.bf16.mxu0 %v3142_v26  ;;  %1799 = vmatprep.subr.bf16.mxu1 %v3145_v27  ;;  %v3223_v26 = vld [vmem:[#allocation5 + $0x4fc] ss:$48 sps:$4 sm:$0xff]   ;;  %v3218_v27 = vld [vmem:[#allocation5 + $0x4f0] ss:$48 sps:$4 sm:$0xff]  }
  0x89   :  { %2869 = vmatmul.mubr.msk.bf16.vlgmr.msra.gmra.mrb[0].mxu0 %vm1437_vm1, %v3587_v32  ;;  %2872 = vmatmul.mubr.msk.bf16.vlgmr.msra.gmra.mrb[0].mxu1 %vm1437_vm1, %v3587_v32 }
  0x8a   :  { %1694 = vmatpush1.bf16.msra.mxu0 %v3140_v31  ;;  %1800 = vmatpush1.bf16.msra.mxu1 %v3143_v33  ;;  %v3229_v31 = vld [vmem:[#allocation5 + $0x55c] ss:$48 sps:$4 sm:$0xff]   ;;  %v3224_v33 = vld [vmem:[#allocation5 + $0x550] ss:$48 sps:$4 sm:$0xff]  }
  0x8b   :  { %1695 = vmatprep.subr.bf16.mxu0 %v3148_v34  ;;  %1801 = vmatprep.subr.bf16.mxu1 %v3151_v35  ;;  %v3227_v34 = vld [vmem:[#allocation5 + $0x558] ss:$48 sps:$4 sm:$0xff]   ;;  %v3232_v35 = vld [vmem:[#allocation5 + $0x5b4] ss:$48 sps:$4 sm:$0xff]  }
  0x8c   :  { %1576 = vmatprep.mubr.bf16.mxu0 %v3495_v30  ;;  %1682 = vmatprep.mubr.bf16.mxu1 %v3495_v30 }
  0x8e   :  { %1696 = vmatpush1.bf16.msra.mxu0 %v3146_v36  ;;  %1802 = vmatpush1.bf16.msra.mxu1 %v3149_v37  ;;  %v3235_v36 = vld [vmem:[#allocation5 + $0x5bc] ss:$48 sps:$4 sm:$0xff]   ;;  %v3230_v37 = vld [vmem:[#allocation5 + $0x5b0] ss:$48 sps:$4 sm:$0xff]  }
  0x8f   :  { %1697 = vmatprep.subr.bf16.mxu0 %v3154_v40  ;;  %1803 = vmatprep.subr.bf16.mxu1 %v3157_v41  ;;  %v3241_v40 = vld [vmem:[#allocation5 + $0x61c] ss:$48 sps:$4 sm:$0xff]   ;;  %v3236_v41 = vld [vmem:[#allocation5 + $0x610] ss:$48 sps:$4 sm:$0xff]  }
  0x91   :  { %2870 = vmatmul.mubr.msk.bf16.gmra.mrb[4].mxu0 %vm1437_vm1, %v3595_v43  ;;  %2873 = vmatmul.mubr.msk.bf16.gmra.mrb[4].mxu1 %vm1437_vm1, %v3595_v43 }
  0x92   :  { %1698 = vmatpush1.bf16.msra.mxu0 %v3152_v42  ;;  %1804 = vmatpush1.bf16.msra.mxu1 %v3155_v44  ;;  %v3239_v42 = vld [vmem:[#allocation5 + $0x618] ss:$48 sps:$4 sm:$0xff]   ;;  %v3244_v44 = vld [vmem:[#allocation5 + $0x674] ss:$48 sps:$4 sm:$0xff]  }
  0x93   :  { %1699 = vmatprep.subr.bf16.mxu0 %v3160_v45  ;;  %1805 = vmatprep.subr.bf16.mxu1 %v3163_v46  ;;  %v3242_v45 = vld [vmem:[#allocation5 + $0x670] ss:$48 sps:$4 sm:$0xff]   ;;  %v3247_v46 = vld [vmem:[#allocation5 + $0x67c] ss:$48 sps:$4 sm:$0xff]  }
  0x94   :  { %1725 = vmatprep.mubr.bf16.mxu0 %v3565_v51  ;;  %1831 = vmatprep.mubr.bf16.mxu1 %v3565_v51 }
  0x96   :  { %1700 = vmatpush1.bf16.msra.mxu0 %v3158_v47  ;;  %1806 = vmatpush1.bf16.msra.mxu1 %v3161_v48  ;;  %v3248_v47 = vld [vmem:[#allocation5 + $0x6d4] ss:$48 sps:$4 sm:$0x3f]   ;;  %v3250_v48 = vld [vmem:[#allocation5 + $0x6dc] ss:$48 sps:$4 sm:$0x3f]  }
  0x97   :  { %1701 = vmatprep.subr.bf16.mxu0 %v3166_v49  ;;  %1807 = vmatprep.subr.bf16.mxu1 %v3169_v50  ;;  %v3245_v49 = vld [vmem:[#allocation5 + $0x678] ss:$48 sps:$4 sm:$0xff]   ;;  %v3252_v50 = vld [vmem:[#allocation5 + $0x6d0] ss:$48 sps:$4 sm:$0x3f]  }
  0x9a   :  { %1702 = vmatpush1.bf16.msra.mxu0 %v3164_v52  ;;  %1808 = vmatpush1.bf16.msra.mxu1 %v3167_v53  ;;  %v3253_v52 = vld [vmem:[#allocation5 + $0x6d8] ss:$48 sps:$4 sm:$0x3f]   ;;  %v1458_v53 = vsel %vm1444_vm0, %v3252_v50, 0  ;;  %v3332_v50 = vld [vmem:[#allocation5 + $0x500] ss:$48 sps:$4 sm:$0xff]  }
  0x9b   :  { %1703 = vmatprep.subr.bf16.mxu0 %v3172_v54  ;;  %1809 = vmatprep.subr.bf16.mxu1 %v3175_v55  ;;  %v1464_v54 = vsel %vm1444_vm0, %v3253_v52, 0  ;;  %v3256_v55 = vld [vmem:[#allocation5 + $0x24] ss:$48 sps:$4 sm:$0xff]   ;;  %v3335_v52 = vld [vmem:[#allocation5 + $0x508] ss:$48 sps:$4 sm:$0xff]  }
  0x9e   :  { %1704 = vmatpush1.bf16.msra.mxu0 %v3170_v56  ;;  %1810 = vmatpush1.bf16.msra.mxu1 %v3173_v57  ;;  %v3259_v56 = vld [vmem:[#allocation5 + $0x2c] ss:$48 sps:$4 sm:$0xff]   ;;  %v3254_v57 = vld [vmem:[#allocation5 + $0x20] ss:$48 sps:$4 sm:$0xff]  }
  0x9f   :  { %1705 = vmatprep.subr.bf16.mxu0 %v3178_v58  ;;  %1811 = vmatprep.subr.bf16.mxu1 %v3181_v59  ;;  %v3257_v58 = vld [vmem:[#allocation5 + $0x28] ss:$48 sps:$4 sm:$0xff]   ;;  %v3262_v59 = vld [vmem:[#allocation5 + $0x84] ss:$48 sps:$4 sm:$0xff]  }
  0xa2   :  { %1706 = vmatpush1.bf16.msra.mxu0 %v3176_v60  ;;  %1812 = vmatpush1.bf16.msra.mxu1 %v3179_v61  ;;  %v3265_v60 = vld [vmem:[#allocation5 + $0x8c] ss:$48 sps:$4 sm:$0xff]   ;;  %v3260_v61 = vld [vmem:[#allocation5 + $0x80] ss:$48 sps:$4 sm:$0xff]  }
  0xa3   :  { %1707 = vmatprep.subr.bf16.mxu0 %v3184_v62  ;;  %1813 = vmatprep.subr.bf16.mxu1 %v3187_v63  ;;  %v3263_v62 = vld [vmem:[#allocation5 + $0x88] ss:$48 sps:$4 sm:$0xff]   ;;  %v3268_v63 = vld [vmem:[#allocation5 + $0xe4] ss:$48 sps:$4 sm:$0xff]  }
  0xa6   :  { %1708 = vmatpush1.bf16.msra.mxu0 %v3182_v0  ;;  %1814 = vmatpush1.bf16.msra.mxu1 %v3185_v1  ;;  %v3271_v0 = vld [vmem:[#allocation5 + $0xec] ss:$48 sps:$4 sm:$0xff]   ;;  %v3266_v1 = vld [vmem:[#allocation5 + $0xe0] ss:$48 sps:$4 sm:$0xff]  }
  0xa7   :  { %1709 = vmatprep.subr.bf16.mxu0 %v3190_v2  ;;  %1815 = vmatprep.subr.bf16.mxu1 %v3193_v3  ;;  %v3269_v2 = vld [vmem:[#allocation5 + $0xe8] ss:$48 sps:$4 sm:$0xff]   ;;  %v3274_v3 = vld [vmem:[#allocation5 + $0x144] ss:$48 sps:$4 sm:$0xff]  }
  0xaa   :  { %1710 = vmatpush1.bf16.msra.mxu0 %v3188_v4  ;;  %1816 = vmatpush1.bf16.msra.mxu1 %v3191_v5  ;;  %v3277_v4 = vld [vmem:[#allocation5 + $0x14c] ss:$48 sps:$4 sm:$0xff]   ;;  %v3272_v5 = vld [vmem:[#allocation5 + $0x140] ss:$48 sps:$4 sm:$0xff]  }
  0xab   :  { %1711 = vmatprep.subr.bf16.mxu0 %v3196_v6  ;;  %1817 = vmatprep.subr.bf16.mxu1 %v3199_v7  ;;  %v3275_v6 = vld [vmem:[#allocation5 + $0x148] ss:$48 sps:$4 sm:$0xff]   ;;  %v3280_v7 = vld [vmem:[#allocation5 + $0x1a4] ss:$48 sps:$4 sm:$0xff]  }
  0xae   :  { %1712 = vmatpush1.bf16.msra.mxu0 %v3194_v8  ;;  %1818 = vmatpush1.bf16.msra.mxu1 %v3197_v10  ;;  %v3283_v8 = vld [vmem:[#allocation5 + $0x1ac] ss:$48 sps:$4 sm:$0xff]   ;;  %v3278_v10 = vld [vmem:[#allocation5 + $0x1a0] ss:$48 sps:$4 sm:$0xff]  }
  0xaf   :  { %1713 = vmatprep.subr.bf16.mxu0 %v3202_v11  ;;  %1819 = vmatprep.subr.bf16.mxu1 %v3205_v12  ;;  %v3281_v11 = vld [vmem:[#allocation5 + $0x1a8] ss:$48 sps:$4 sm:$0xff]   ;;  %v3286_v12 = vld [vmem:[#allocation5 + $0x204] ss:$48 sps:$4 sm:$0xff]  }
  0xb2   :  { %1714 = vmatpush1.bf16.msra.mxu0 %v3200_v14  ;;  %1820 = vmatpush1.bf16.msra.mxu1 %v3203_v15  ;;  %v3289_v14 = vld [vmem:[#allocation5 + $0x20c] ss:$48 sps:$4 sm:$0xff]   ;;  %v3284_v15 = vld [vmem:[#allocation5 + $0x200] ss:$48 sps:$4 sm:$0xff]  }
  0xb3   :  { %1715 = vmatprep.subr.bf16.mxu0 %v3208_v16  ;;  %1821 = vmatprep.subr.bf16.mxu1 %v3211_v17  ;;  %v3287_v16 = vld [vmem:[#allocation5 + $0x208] ss:$48 sps:$4 sm:$0xff]   ;;  %v3292_v17 = vld [vmem:[#allocation5 + $0x264] ss:$48 sps:$4 sm:$0xff]  }
  0xb6   :  { %1716 = vmatpush1.bf16.msra.mxu0 %v3206_v18  ;;  %1822 = vmatpush1.bf16.msra.mxu1 %v3209_v19  ;;  %v3295_v18 = vld [vmem:[#allocation5 + $0x26c] ss:$48 sps:$4 sm:$0xff]   ;;  %v3290_v19 = vld [vmem:[#allocation5 + $0x260] ss:$48 sps:$4 sm:$0xff]  }
  0xb7   :  { %1717 = vmatprep.subr.bf16.mxu0 %v3214_v20  ;;  %1823 = vmatprep.subr.bf16.mxu1 %v3217_v21  ;;  %v3298_v20 = vld [vmem:[#allocation5 + $0x2c4] ss:$48 sps:$4 sm:$0xff]   ;;  %v3301_v21 = vld [vmem:[#allocation5 + $0x2cc] ss:$48 sps:$4 sm:$0xff]  }
  0xba   :  { %1718 = vmatpush1.bf16.msra.mxu0 %v3212_v22  ;;  %1824 = vmatpush1.bf16.msra.mxu1 %v3215_v24  ;;  %v3296_v22 = vld [vmem:[#allocation5 + $0x2c0] ss:$48 sps:$4 sm:$0xff]   ;;  %v3299_v24 = vld [vmem:[#allocation5 + $0x2c8] ss:$48 sps:$4 sm:$0xff]  }
  0xbb   :  { %1719 = vmatprep.subr.bf16.mxu0 %v3220_v25  ;;  %1825 = vmatprep.subr.bf16.mxu1 %v3223_v26  ;;  %v3304_v25 = vld [vmem:[#allocation5 + $0x324] ss:$48 sps:$4 sm:$0xff]   ;;  %v3307_v26 = vld [vmem:[#allocation5 + $0x32c] ss:$48 sps:$4 sm:$0xff]  }
  0xbe   :  { %1720 = vmatpush1.bf16.msra.mxu0 %v3218_v27  ;;  %1826 = vmatpush1.bf16.msra.mxu1 %v3221_v28  ;;  %v3302_v27 = vld [vmem:[#allocation5 + $0x320] ss:$48 sps:$4 sm:$0xff]   ;;  %v3305_v28 = vld [vmem:[#allocation5 + $0x328] ss:$48 sps:$4 sm:$0xff]  }
  0xbf   :  { %1721 = vmatprep.subr.bf16.mxu0 %v3226_v29  ;;  %1827 = vmatprep.subr.bf16.mxu1 %v3229_v31  ;;  %v3310_v29 = vld [vmem:[#allocation5 + $0x384] ss:$48 sps:$4 sm:$0xff]   ;;  %v3313_v31 = vld [vmem:[#allocation5 + $0x38c] ss:$48 sps:$4 sm:$0xff]  }
  0xc2   :  { %1722 = vmatpush1.bf16.msra.mxu0 %v3224_v33  ;;  %1828 = vmatpush1.bf16.msra.mxu1 %v3227_v34  ;;  %v3308_v33 = vld [vmem:[#allocation5 + $0x380] ss:$48 sps:$4 sm:$0xff]   ;;  %v3311_v34 = vld [vmem:[#allocation5 + $0x388] ss:$48 sps:$4 sm:$0xff]  }
  0xc3   :  { %1723 = vmatprep.subr.bf16.mxu0 %v3232_v35  ;;  %1829 = vmatprep.subr.bf16.mxu1 %v3235_v36  ;;  %v3316_v35 = vld [vmem:[#allocation5 + $0x3e4] ss:$48 sps:$4 sm:$0xff]   ;;  %v3319_v36 = vld [vmem:[#allocation5 + $0x3ec] ss:$48 sps:$4 sm:$0xff]  }
  0xc6   :  { %1724 = vmatpush1.bf16.msra.mxu0 %v3230_v37  ;;  %1830 = vmatpush1.bf16.msra.mxu1 %v3233_v38  ;;  %v3314_v37 = vld [vmem:[#allocation5 + $0x3e0] ss:$48 sps:$4 sm:$0xff]   ;;  %v3317_v38 = vld [vmem:[#allocation5 + $0x3e8] ss:$48 sps:$4 sm:$0xff]  }
  0xc7   :  { %1746 = vmatprep.subr.bf16.mxu0 %v3238_v39  ;;  %1852 = vmatprep.subr.bf16.mxu1 %v3241_v40  ;;  %v3322_v39 = vld [vmem:[#allocation5 + $0x444] ss:$48 sps:$4 sm:$0xff]   ;;  %v3325_v40 = vld [vmem:[#allocation5 + $0x44c] ss:$48 sps:$4 sm:$0xff]  }
  0xc9   :  { %1726 = vmatmul.mubr.bf16.vlgmr.msra.gmra.mrb[8].mxu0 %v3569_v9  ;;  %1832 = vmatmul.mubr.bf16.vlgmr.msra.gmra.mrb[8].mxu1 %v3569_v9 }
  0xca   :  { %1747 = vmatpush1.bf16.msra.mxu0 %v3236_v41  ;;  %1853 = vmatpush1.bf16.msra.mxu1 %v3239_v42  ;;  %v3320_v41 = vld [vmem:[#allocation5 + $0x440] ss:$48 sps:$4 sm:$0xff]   ;;  %v3323_v42 = vld [vmem:[#allocation5 + $0x448] ss:$48 sps:$4 sm:$0xff]  }
  0xcb   :  { %1748 = vmatprep.subr.bf16.mxu0 %v3244_v44  ;;  %1735 = vmatprep.mubr.bf16.mxu0 %v3571_v13  ;;  %v3328_v44 = vld [vmem:[#allocation5 + $0x4a4] ss:$48 sps:$4 sm:$0xff]  }
  0xcc   :  { %1841 = vmatprep.mubr.bf16.mxu1 %v3571_v13  ;;  %1854 = vmatprep.subr.bf16.mxu1 %v3247_v46  ;;  %v3326_v46 = vld [vmem:[#allocation5 + $0x4a0] ss:$48 sps:$4 sm:$0xff]  }
  0xce   :  { %1749 = vmatpush1.bf16.msra.mxu0 %v3242_v45  ;;  %1855 = vmatpush1.bf16.msra.mxu1 %v3245_v49  ;;  %v3331_v45 = vld [vmem:[#allocation5 + $0x4ac] ss:$48 sps:$4 sm:$0xff]  }
  0xcf   :  { %2874 = vmatprep.subr.msk.bf16.mxu0 %vm1444_vm0, %v3248_v47  ;;  %2877 = vmatprep.subr.msk.bf16.mxu1 %vm1444_vm0, %v3250_v48  ;;  %v3329_v47 = vld [vmem:[#allocation5 + $0x4a8] ss:$48 sps:$4 sm:$0xff]   ;;  %v3334_v48 = vld [vmem:[#allocation5 + $0x504] ss:$48 sps:$4 sm:$0xff]   ;;  %v3337_v49 = vld [vmem:[#allocation5 + $0x50c] ss:$48 sps:$4 sm:$0xff]  }
  0xd1   :  { %1736 = vmatmul.mubr.bf16.gmra.mrb[12].mxu0 %v3577_v23  ;;  %1842 = vmatmul.mubr.bf16.gmra.mrb[12].mxu1 %v3577_v23 }
  0xd2   :  { %1751 = vmatpush1.bf16.msra.mxu0 %v1458_v53  ;;  %1857 = vmatpush1.bf16.msra.mxu1 %v1464_v54  ;;  %v3340_v53 = vld [vmem:[#allocation5 + $0x564] ss:$48 sps:$4 sm:$0xff]   ;;  %v3343_v54 = vld [vmem:[#allocation5 + $0x56c] ss:$48 sps:$4 sm:$0xff]  }
  0xd3   :  { %1778 = vmatprep.mubr.bf16.mxu0 %v3495_v30  ;;  %1884 = vmatprep.mubr.bf16.mxu1 %v3495_v30 }
  0xd4   :  { %1905 = vmatprep.subr.bf16.mxu0 %v3256_v55  ;;  %2011 = vmatprep.subr.bf16.mxu1 %v3259_v56  ;;  %v3338_v55 = vld [vmem:[#allocation5 + $0x560] ss:$48 sps:$4 sm:$0xff]   ;;  %v3341_v56 = vld [vmem:[#allocation5 + $0x568] ss:$48 sps:$4 sm:$0xff]  }
  0xd9   :  { %2875 = vmatmul.mubr.msk.bf16.vlgmr.msra.gmra.mrb[8].mxu0 %vm1437_vm1, %v3587_v32  ;;  %2878 = vmatmul.mubr.msk.bf16.vlgmr.msra.gmra.mrb[8].mxu1 %vm1437_vm1, %v3587_v32 }
  0xda   :  { %1906 = vmatpush1.bf16.msra.mxu0 %v3254_v57  ;;  %2012 = vmatpush1.bf16.msra.mxu1 %v3257_v58  ;;  %v3346_v57 = vld [vmem:[#allocation5 + $0x5c4] ss:$48 sps:$4 sm:$0xff]   ;;  %v3349_v58 = vld [vmem:[#allocation5 + $0x5cc] ss:$48 sps:$4 sm:$0xff]  }
  0xdb   :  { %1907 = vmatprep.subr.bf16.mxu0 %v3262_v59  ;;  %2013 = vmatprep.subr.bf16.mxu1 %v3265_v60  ;;  %v3344_v59 = vld [vmem:[#allocation5 + $0x5c0] ss:$48 sps:$4 sm:$0xff]   ;;  %v3347_v60 = vld [vmem:[#allocation5 + $0x5c8] ss:$48 sps:$4 sm:$0xff]  }
  0xdc   :  { %1788 = vmatprep.mubr.bf16.mxu0 %v3495_v30  ;;  %1894 = vmatprep.mubr.bf16.mxu1 %v3495_v30 }
  0xde   :  { %1908 = vmatpush1.bf16.msra.mxu0 %v3260_v61  ;;  %2014 = vmatpush1.bf16.msra.mxu1 %v3263_v62  ;;  %v3352_v61 = vld [vmem:[#allocation5 + $0x624] ss:$48 sps:$4 sm:$0xff]   ;;  %v3355_v62 = vld [vmem:[#allocation5 + $0x62c] ss:$48 sps:$4 sm:$0xff]  }
  0xdf   :  { %1909 = vmatprep.subr.bf16.mxu0 %v3268_v63  ;;  %2015 = vmatprep.subr.bf16.mxu1 %v3271_v0  ;;  %v3350_v63 = vld [vmem:[#allocation5 + $0x620] ss:$48 sps:$4 sm:$0xff]   ;;  %v3353_v0 = vld [vmem:[#allocation5 + $0x628] ss:$48 sps:$4 sm:$0xff]  }
  0xe1   :  { %2876 = vmatmul.mubr.msk.bf16.gmra.mrb[12].mxu0 %vm1437_vm1, %v3595_v43  ;;  %2879 = vmatmul.mubr.msk.bf16.gmra.mrb[12].mxu1 %vm1437_vm1, %v3595_v43 }
  0xe2   :  { %1910 = vmatpush1.bf16.msra.mxu0 %v3266_v1  ;;  %2016 = vmatpush1.bf16.msra.mxu1 %v3269_v2  ;;  %v3358_v1 = vld [vmem:[#allocation5 + $0x684] ss:$48 sps:$4 sm:$0xff]   ;;  %v3361_v2 = vld [vmem:[#allocation5 + $0x68c] ss:$48 sps:$4 sm:$0xff]  }
  0xe3   :  { %1911 = vmatprep.subr.bf16.mxu0 %v3274_v3  ;;  %2017 = vmatprep.subr.bf16.mxu1 %v3277_v4  ;;  %v3356_v3 = vld [vmem:[#allocation5 + $0x680] ss:$48 sps:$4 sm:$0xff]   ;;  %v3359_v4 = vld [vmem:[#allocation5 + $0x688] ss:$48 sps:$4 sm:$0xff]  }
  0xe4   :  { %1937 = vmatprep.mubr.bf16.mxu0 %v3565_v51  ;;  %2043 = vmatprep.mubr.bf16.mxu1 %v3565_v51  ;;  %v3293_v51 = vld [vmem:[#allocation5 + $0x268] ss:$48 sps:$4 sm:$0xff]  }
  0xe6   :  { %1912 = vmatpush1.bf16.msra.mxu0 %v3272_v5  ;;  %2018 = vmatpush1.bf16.msra.mxu1 %v3275_v6  ;;  %v3362_v5 = vld [vmem:[#allocation5 + $0x6e4] ss:$48 sps:$4 sm:$0x3f]   ;;  %v3364_v6 = vld [vmem:[#allocation5 + $0x6e0] ss:$48 sps:$4 sm:$0x3f]  }
  0xe7   :  { %1913 = vmatprep.subr.bf16.mxu0 %v3280_v7  ;;  %2019 = vmatprep.subr.bf16.mxu1 %v3283_v8  ;;  %v3365_v7 = vld [vmem:[#allocation5 + $0x6ec] ss:$48 sps:$4 sm:$0x3f]   ;;  %v3367_v8 = vld [vmem:[#allocation5 + $0x6e8] ss:$48 sps:$4 sm:$0x3f]  }
  0xea   :  { %1914 = vmatpush1.bf16.msra.mxu0 %v3278_v10  ;;  %2020 = vmatpush1.bf16.msra.mxu1 %v3281_v11  ;;  %v1476_v10 = vsel %vm1444_vm0, %v3367_v8, 0  ;;  %v3370_v11 = vld [vmem:[#allocation7 + $0x48] sm:$0xff]  }
  0xeb   :  { %1915 = vmatprep.subr.bf16.mxu0 %v3286_v12  ;;  %2021 = vmatprep.subr.bf16.mxu1 %v3289_v14  ;;  %v3371_v12 = vld [vmem:[#allocation7 + $0x8] sm:$0xff]   ;;  %v3372_v14 = vld [vmem:[#allocation7 + $0x50] sm:$0xff]  }
  0xee   :  { %1916 = vmatpush1.bf16.msra.mxu0 %v3284_v15  ;;  %2022 = vmatpush1.bf16.msra.mxu1 %v3287_v16  ;;  %v3374_v15 = vld [vmem:[#allocation7 + $0x58] sm:$0xff]   ;;  %v3376_v16 = vld [vmem:[#allocation7 + $0x60] sm:$0xff]  }
  0xef   :  { %1917 = vmatprep.subr.bf16.mxu0 %v3292_v17  ;;  %2023 = vmatprep.subr.bf16.mxu1 %v3295_v18  ;;  %v3377_v17 = vld [vmem:[#allocation7 + $0x20] sm:$0xff]   ;;  %v3378_v18 = vld [vmem:[#allocation7 + $0x68] sm:$0xff]  }
  0xf2   :  { %1918 = vmatpush1.bf16.msra.mxu0 %v3290_v19  ;;  %2024 = vmatpush1.bf16.msra.mxu1 %v3293_v51  ;;  %v3380_v19 = vld [vmem:[#allocation7 + $0x70] sm:$0xff]  }
  0xf3   :  { %1919 = vmatprep.subr.bf16.mxu0 %v3298_v20  ;;  %2025 = vmatprep.subr.bf16.mxu1 %v3301_v21  ;;  %v3381_v51 = vld [vmem:[#allocation7 + $0x30] sm:$0xff]   ;;  %v3382_v20 = vld [vmem:[#allocation7 + $0x78] sm:$0xff]  }
  0xf4   :  { %v3383_v21 = vld [vmem:[#allocation7 + $0x38] sm:$0xff]  }
  0xf6   :  { %1920 = vmatpush1.bf16.msra.mxu0 %v3296_v22  ;;  %2026 = vmatpush1.bf16.msra.mxu1 %v3299_v24  ;;  %v2117_v22 = vlaneseq }
  0xf7   :  { %1921 = vmatprep.subr.bf16.mxu0 %v3304_v25  ;;  %2027 = vmatprep.subr.bf16.mxu1 %v3307_v26 }
  0xf8   :  { %v3649_v24 = vshrl.u32 %v2117_v22, 7 }
  0xfa   :  { %1922 = vmatpush1.bf16.msra.mxu0 %v3302_v27  ;;  %2028 = vmatpush1.bf16.msra.mxu1 %v3305_v28  ;;  %vm2137_vm2 = vcmp.lt.s32.totalorder %v3649_v24, 6  ;;  %vm2124_vm3 = vcmp.lt.s32.totalorder %v3649_v24, 7  ;;  %vm2205_vm7 = vcmp.lt.s32.totalorder %v3649_v24, 5  ;;  %vm2285_vm9 = vcmp.lt.s32.totalorder %v3649_v24, 4 }
  0xfb   :  { %1923 = vmatprep.subr.bf16.mxu0 %v3310_v29  ;;  %2029 = vmatprep.subr.bf16.mxu1 %v3313_v31 }
  0xfe   :  { %1924 = vmatpush1.bf16.msra.mxu0 %v3308_v33  ;;  %2030 = vmatpush1.bf16.msra.mxu1 %v3311_v34 }
  0xff   :  { %1925 = vmatprep.subr.bf16.mxu0 %v3316_v35  ;;  %2031 = vmatprep.subr.bf16.mxu1 %v3319_v36 }
 0x102   :  { %1926 = vmatpush1.bf16.msra.mxu0 %v3314_v37  ;;  %2032 = vmatpush1.bf16.msra.mxu1 %v3317_v38 }
 0x103   :  { %1927 = vmatprep.subr.bf16.mxu0 %v3322_v39  ;;  %2033 = vmatprep.subr.bf16.mxu1 %v3325_v40 }
 0x106   :  { %1928 = vmatpush1.bf16.msra.mxu0 %v3320_v41  ;;  %2034 = vmatpush1.bf16.msra.mxu1 %v3323_v42 }
 0x107   :  { %1929 = vmatprep.subr.bf16.mxu0 %v3328_v44  ;;  %2035 = vmatprep.subr.bf16.mxu1 %v3331_v45 }
 0x10a   :  { %1930 = vmatpush1.bf16.msra.mxu0 %v3326_v46  ;;  %2036 = vmatpush1.bf16.msra.mxu1 %v3329_v47 }
 0x10b   :  { %1931 = vmatprep.subr.bf16.mxu0 %v3334_v48  ;;  %2037 = vmatprep.subr.bf16.mxu1 %v3337_v49  ;;  %v3664_v49 = vadd.s32 8, %v3649_v24 }
 0x10d   :  { %vm2147_vm4 = vcmp.lt.s32.totalorder %v3664_v49, 14  ;;  %vm2215_vm8 = vcmp.lt.s32.totalorder %v3664_v49, 13  ;;  %vm2295_vm10 = vcmp.lt.s32.totalorder %v3664_v49, 12 }
 0x10e   :  { %1932 = vmatpush1.bf16.msra.mxu0 %v3332_v50  ;;  %2038 = vmatpush1.bf16.msra.mxu1 %v3335_v52 }
 0x10f   :  { %1933 = vmatprep.subr.bf16.mxu0 %v3340_v53  ;;  %2039 = vmatprep.subr.bf16.mxu1 %v3343_v54 }
 0x112   :  { %1934 = vmatpush1.bf16.msra.mxu0 %v3338_v55  ;;  %2040 = vmatpush1.bf16.msra.mxu1 %v3341_v56 }
 0x113   :  { %1935 = vmatprep.subr.bf16.mxu0 %v3346_v57  ;;  %2041 = vmatprep.subr.bf16.mxu1 %v3349_v58 }
 0x116   :  { %1936 = vmatpush1.bf16.msra.mxu0 %v3344_v59  ;;  %2042 = vmatpush1.bf16.msra.mxu1 %v3347_v60 }
 0x117   :  { %1958 = vmatprep.subr.bf16.mxu0 %v3352_v61  ;;  %2064 = vmatprep.subr.bf16.mxu1 %v3355_v62 }
 0x119   :  { %1938 = vmatmul.mubr.bf16.vlgmr.msra.gmra.mrb[16].mxu0 %v3569_v9  ;;  %2044 = vmatmul.mubr.bf16.vlgmr.msra.gmra.mrb[16].mxu1 %v3569_v9  ;;  %v1470_v9 = vsel %vm1444_vm0, %v3364_v6, 0 }
 0x11a   :  { %1959 = vmatpush1.bf16.msra.mxu0 %v3350_v63  ;;  %2065 = vmatpush1.bf16.msra.mxu1 %v3353_v0 }
 0x11b   :  { %1960 = vmatprep.subr.bf16.mxu0 %v3358_v1  ;;  %1947 = vmatprep.mubr.bf16.mxu0 %v3571_v13 }
 0x11c   :  { %2053 = vmatprep.mubr.bf16.mxu1 %v3571_v13  ;;  %2066 = vmatprep.subr.bf16.mxu1 %v3361_v2  ;;  %v3368_v13 = vld [vmem:[#allocation7 + $0x40] sm:$0xff]  }
 0x11e   :  { %1961 = vmatpush1.bf16.msra.mxu0 %v3356_v3  ;;  %2067 = vmatpush1.bf16.msra.mxu1 %v3359_v4 }
 0x11f   :  { %2880 = vmatprep.subr.msk.bf16.mxu0 %vm1444_vm0, %v3362_v5  ;;  %2883 = vmatprep.subr.msk.bf16.mxu1 %vm1444_vm0, %v3365_v7 }
 0x121   :  { %1948 = vmatmul.mubr.bf16.gmra.mrb[20].mxu0 %v3577_v23  ;;  %2054 = vmatmul.mubr.bf16.gmra.mrb[20].mxu1 %v3577_v23  ;;  %v3369_v23 = vld [vmem:[#allocation7] sm:$0xff]  }
 0x122   :  { %1963 = vmatpush1.bf16.msra.mxu0 %v1470_v9  ;;  %2069 = vmatpush1.bf16.msra.mxu1 %v1476_v10 }
 0x123   :  { %1990 = vmatprep.mubr.bf16.mxu0 %v3495_v30  ;;  %2096 = vmatprep.mubr.bf16.mxu1 %v3495_v30 }
 0x124   :  { %2914 = vmatprep.subr.bf16.mxu0 %v3368_v13 }
 0x129   :  { %2881 = vmatmul.mubr.msk.bf16.vlgmr.msra.gmra.mrb[16].mxu0 %vm1437_vm1, %v3587_v32  ;;  %2884 = vmatmul.mubr.msk.bf16.vlgmr.msra.gmra.mrb[16].mxu1 %vm1437_vm1, %v3587_v32  ;;  %v3373_v32 = vld [vmem:[#allocation7 + $0x10] sm:$0xff]  }
 0x12a   :  { %2000 = vmatprep.mubr.bf16.mxu0 %v3495_v30  ;;  %2106 = vmatprep.mubr.bf16.mxu1 %v3495_v30  ;;  %v3375_v30 = vld [vmem:[#allocation7 + $0x18] sm:$0xff]  }
 0x12b   :  { %2915 = vmatpush3.bf16.msra.mxu0 %v3369_v23 }
 0x12c   :  { %2916 = vmatprep.subr.bf16.mxu0 %v3370_v11 }
 0x12f   :  { %2917 = vmatpush3.bf16.msra.mxu0 %v3371_v12 }
 0x130   :  { %2918 = vmatprep.subr.bf16.mxu0 %v3372_v14 }
 0x131   :  { %2882 = vmatmul.mubr.msk.bf16.gmra.mrb[20].mxu0 %vm1437_vm1, %v3595_v43  ;;  %2885 = vmatmul.mubr.msk.bf16.gmra.mrb[20].mxu1 %vm1437_vm1, %v3595_v43  ;;  %v3379_v43 = vld [vmem:[#allocation7 + $0x28] sm:$0xff]  }
 0x133   :  { %2919 = vmatpush3.bf16.msra.mxu0 %v3373_v32 }
 0x134   :  { %2920 = vmatprep.subr.bf16.mxu0 %v3374_v15 }
 0x137   :  { %2921 = vmatpush3.bf16.msra.mxu0 %v3375_v30 }
 0x138   :  { %2922 = vmatprep.subr.bf16.mxu0 %v3376_v16 }
 0x13b   :  { %2923 = vmatpush3.bf16.msra.mxu0 %v3377_v17 }
 0x13c   :  { %2924 = vmatprep.subr.bf16.mxu0 %v3378_v18  ;;  %v2886_v18 = vld [vmem:[%s3790_s2] ss:$0 sm:$0xff] }
 0x13f   :  { %2925 = vmatpush3.bf16.msra.mxu0 %v3379_v43 }
 0x140   :  { %2926 = vmatprep.subr.bf16.mxu0 %v3380_v19 }
 0x143   :  { %2927 = vmatpush3.bf16.msra.mxu0 %v3381_v51 }
 0x144   :  { %2928 = vmatprep.subr.bf16.mxu0 %v3382_v20 }
 0x147   :  { %2929 = vmatpush3.bf16.msra.mxu0 %v3383_v21 }
 0x15c   :  { %v1568_v25 = vpop.f32.mrb[0].mxu0  ;;  %v1674_v26 = vpop.f32.mrb[0].mxu1 }
 0x15d   :  { %v1570_v27 = vpop.f32.mrb[1].mxu0  ;;  %v3651_v28 = vpop.f32.mrb[1].mxu1  ;;  %v2133_v33 = vrot.slane %v1674_v26, 2  ;;  %v3384_v26 = vld [vmem:[#allocation7 + $0x80] sm:$0xff]  }
 0x15e   :  { %v1572_v29 = vpop.f32.mrb[2].mxu0  ;;  %v1678_v31 = vpop.f32.mrb[2].mxu1  ;;  %v2120_v37 = vrot.slane %v1570_v27, 1  ;;  %v3496_v27 = vmov 0.0  }
 0x15f   :  { %v2134_v34 = vrot.slane %v1678_v31, 2  ;;  %v1574_v35 = vpop.f32.mrb[3].mxu0  ;;  %v3655_v36 = vpop.f32.mrb[3].mxu1  ;;  %2945 = vmatprep.subr.bf16.mxu1 %v3496_v27  ;;  %v3386_v31 = vld [vmem:[#allocation7 + $0x90] sm:$0xff]   ;;  %2961 = vmatprep.mubr.msk.bf16.mxu1 %vm3497_vm6, %v3496_v27 }
 0x160   :  { %v2121_v38 = vrot.slane %v1574_v35, 1  ;;  %2946 = vmatpush3.bf16.msra.mxu1 %v3384_v26  ;;  %v3389_v35 = vld [vmem:[#allocation7 + $0xa8] sm:$0xff]  }
 0x161   :  { %v2140_v39 = vsel %vm2137_vm2, %v2133_v33, %v2134_v34  ;;  %2947 = vmatprep.subr.bf16.mxu1 %v3496_v27 }
 0x162   :  { %v2127_v40 = vsel %vm2124_vm3, %v2120_v37, %v2121_v38 }
 0x163   :  { %v2129_v41 = vadd.f32 %v2127_v40, %v1568_v25 }
 0x164   :  { %v1578_v42 = vpop.f32.mrb[4].mxu0  ;;  %v1684_v44 = vpop.f32.mrb[4].mxu1 }
 0x165   :  { %v2142_v45 = vadd.f32 %v2140_v39, %v2129_v41  ;;  %v2135_v46 = vrot.slane %v1684_v44, 2  ;;  %v1580_v47 = vpop.f32.mrb[5].mxu0  ;;  %v3661_v48 = vpop.f32.mrb[5].mxu1 }
 0x166   :  { %v2122_v50 = vrot.slane %v1580_v47, 1  ;;  %v1582_v52 = vpop.f32.mrb[6].mxu0  ;;  %v1688_v53 = vpop.f32.mrb[6].mxu1 }
 0x167   :  { %v2139_v54 = vsel %vm2137_vm2, %v2134_v34, %v2135_v46  ;;  %v2136_v55 = vrot.slane %v1688_v53, 2  ;;  %v1584_v56 = vpop.f32.mrb[7].mxu0  ;;  %v3668_v57 = vpop.f32.mrb[7].mxu1  ;;  %v3388_v34 = vld [vmem:[#allocation7 + $0xa0] sm:$0xff]  }
 0x168   :  { %v2126_v58 = vsel %vm2124_vm3, %v2121_v38, %v2122_v50  ;;  %v2123_v59 = vrot.slane %v1584_v56, 1  ;;  %v3391_v38 = vld [vmem:[#allocation7 + $0xb8] sm:$0xff]  }
 0x169   :  { %v2130_v60 = vadd.f32 %v2126_v58, %v1572_v29  ;;  %v2138_v61 = vsel %vm2137_vm2, %v2135_v46, %v2136_v55  ;;  %v2141_v62 = vsel %vm2137_vm2, %v2136_v55, %v2133_v33  ;;  %v3385_v29 = vld [vmem:[#allocation7 + $0x88] sm:$0xff]   ;;  %v3387_v33 = vld [vmem:[#allocation7 + $0x98] sm:$0xff]  }
 0x16a   :  { %v2125_v63 = vsel %vm2124_vm3, %v2122_v50, %v2123_v59  ;;  %v2128_v0 = vsel %vm2124_vm3, %v2123_v59, %v2120_v37  ;;  %2948 = vmatpush3.bf16.msra.mxu1 %v3385_v29  ;;  %v3390_v37 = vld [vmem:[#allocation7 + $0xb0] sm:$0xff]  }
 0x16b   :  { %v2143_v1 = vadd.f32 %v2139_v54, %v2130_v60  ;;  %v2131_v2 = vadd.f32 %v2125_v63, %v1578_v42  ;;  %v2132_v3 = vadd.f32 %v2128_v0, %v1582_v52  ;;  %2949 = vmatprep.subr.bf16.mxu1 %v3496_v27 }
 0x16d   :  { %v2149_v4 = vsel %vm2147_vm4, %v2143_v1, -inf  ;;  %v2144_v5 = vadd.f32 %v2138_v61, %v2131_v2  ;;  %v2145_v6 = vadd.f32 %v2141_v62, %v2132_v3 }
 0x16e   :  { %v2152_v7 = vmax.f32 %v2142_v45, %v2149_v4  ;;  %2950 = vmatpush3.bf16.msra.mxu1 %v3386_v31 }
 0x16f   :  { %v2151_v8 = vsel %vm2147_vm4, %v2145_v6, -inf  ;;  %2951 = vmatprep.subr.bf16.mxu1 %v3496_v27 }
 0x170   :  { %v2153_v9 = vrot.slane %v2152_v7, 4  ;;  %v2159_v10 = vmax.f32 %v2144_v5, %v2151_v8 }
 0x172   :  { %v2154_v13 = vmax.f32 %v2152_v7, %v2153_v9  ;;  %v2160_v23 = vrot.slane %v2159_v10, 4  ;;  %2952 = vmatpush3.bf16.msra.mxu1 %v3387_v33 }
 0x173   :  { %2953 = vmatprep.subr.bf16.mxu1 %v3496_v27 }
 0x174   :  { %v2155_v11 = vrot.slane %v2154_v13, 2  ;;  %v2161_v12 = vmax.f32 %v2159_v10, %v2160_v23 }
 0x176   :  { %v2156_v14 = vmax.f32 %v2154_v13, %v2155_v11  ;;  %v2162_v32 = vrot.slane %v2161_v12, 2  ;;  %2954 = vmatpush3.bf16.msra.mxu1 %v3388_v34 }
 0x177   :  { %2955 = vmatprep.subr.bf16.mxu1 %v3496_v27 }
 0x178   :  { %v2157_v15 = vrot.slane %v2156_v14, 1  ;;  %v2163_v30 = vmax.f32 %v2161_v12, %v2162_v32 }
 0x17a   :  { %v2164_v16 = vrot.slane %v2163_v30, 1  ;;  %v2158_v17 = vmax.f32 %v2156_v14, %v2157_v15  ;;  %2956 = vmatpush3.bf16.msra.mxu1 %v3389_v35 }
 0x17b   :  { %2957 = vmatprep.subr.bf16.mxu1 %v3496_v27 }
 0x17c   :  { %v2165_v43 = vmax.f32 %v2163_v30, %v2164_v16  ;;  %v2173_v19 = vadd.f32 %v2886_v18, %v2158_v17 }
 0x17e   :  { %v2174_v51 = vadd.f32 %v2886_v18, %v2165_v43  ;;  %v2175_v21 = vmax.f32 %v2173_v19, 0.0  ;;  %2958 = vmatpush3.bf16.msra.mxu1 %v3390_v37 }
 0x17f   :  { %2959 = vmatprep.subr.bf16.mxu1 %v3496_v27 }
 0x180   :  { %v2176_v20 = vmax.f32 %v2174_v51, 0.0 }
 0x182   :  { %v2327_v22 = vrot.slane %v2176_v20, 7  ;;  %2960 = vmatpush3.bf16.msra.mxu1 %v3391_v38 }
 0x184   :  { %v3685_v25 = vsel %vm2328_vm5, %v2327_v22, %v2175_v21 }
 0x1ac   :  { %v1780_v39 = vpop.f32.mrb[8].mxu0  ;;  %v1886_v40 = vpop.f32.mrb[8].mxu1 }
 0x1ad   :  { %v1782_v41 = vpop.f32.mrb[9].mxu0  ;;  %v3687_v42 = vpop.f32.mrb[9].mxu1  ;;  %v2177_v46 = vrot.slane %v1780_v39, 1  ;;  %v2201_v47 = vrot.slane %v1886_v40, 3 }
 0x1ae   :  { %v1784_v44 = vpop.f32.mrb[10].mxu0  ;;  %v1890_v45 = vpop.f32.mrb[10].mxu1  ;;  %v2189_v55 = vrot.slane %v1782_v41, 2 }
 0x1af   :  { %v2178_v50 = vrot.slane %v1784_v44, 1  ;;  %v2202_v52 = vrot.slane %v1890_v45, 3  ;;  %v1786_v53 = vpop.f32.mrb[11].mxu0  ;;  %v3690_v54 = vpop.f32.mrb[11].mxu1 }
 0x1b0   :  { %v2190_v56 = vrot.slane %v1786_v53, 2 }
 0x1b1   :  { %v2183_v58 = vsel %vm2124_vm3, %v2177_v46, %v2178_v50  ;;  %v2208_v59 = vsel %vm2205_vm7, %v2201_v47, %v2202_v52 }
 0x1b2   :  { %v2185_v60 = vadd.f32 %v2183_v58, %v3651_v28  ;;  %v2195_v61 = vsel %vm2137_vm2, %v2189_v55, %v2190_v56 }
 0x1b4   :  { %v2197_v62 = vadd.f32 %v2195_v61, %v2185_v60  ;;  %v1790_v63 = vpop.f32.mrb[12].mxu0  ;;  %v1896_v0 = vpop.f32.mrb[12].mxu1  ;;  %v2341_v61 = vpack.c.bf16 %v3685_v25, %v3685_v25 }
 0x1b5   :  { %v2179_v1 = vrot.slane %v1790_v63, 1  ;;  %v2203_v2 = vrot.slane %v1896_v0, 3  ;;  %v1792_v3 = vpop.f32.mrb[13].mxu0  ;;  %v3699_v4 = vpop.f32.mrb[13].mxu1 }
 0x1b6   :  { %v2210_v5 = vadd.f32 %v2208_v59, %v2197_v62  ;;  %v2191_v6 = vrot.slane %v1792_v3, 2  ;;  %v1794_v7 = vpop.f32.mrb[14].mxu0  ;;  %v1900_v8 = vpop.f32.mrb[14].mxu1 }
 0x1b7   :  { %v2182_v9 = vsel %vm2124_vm3, %v2178_v50, %v2179_v1  ;;  %v2207_v28 = vsel %vm2205_vm7, %v2202_v52, %v2203_v2  ;;  %v2180_v10 = vrot.slane %v1794_v7, 1  ;;  %v2204_v13 = vrot.slane %v1900_v8, 3  ;;  %v1796_v23 = vpop.f32.mrb[15].mxu0  ;;  %v3705_v11 = vpop.f32.mrb[15].mxu1 }
 0x1b8   :  { %v2186_v12 = vadd.f32 %v2182_v9, %v3655_v36  ;;  %v2194_v14 = vsel %vm2137_vm2, %v2190_v56, %v2191_v6  ;;  %v2192_v32 = vrot.slane %v1796_v23, 2 }
 0x1b9   :  { %v2181_v15 = vsel %vm2124_vm3, %v2179_v1, %v2180_v10  ;;  %v2184_v30 = vsel %vm2124_vm3, %v2180_v10, %v2177_v46  ;;  %v2206_v16 = vsel %vm2205_vm7, %v2203_v2, %v2204_v13  ;;  %v2209_v17 = vsel %vm2205_vm7, %v2204_v13, %v2201_v47  ;;  %v2887_v47 = vld [vmem:[%s3790_s2 + $0x1] ss:$0 sm:$0xff] }
 0x1ba   :  { %v2198_v18 = vadd.f32 %v2194_v14, %v2186_v12  ;;  %v2187_v43 = vadd.f32 %v2181_v15, %v3661_v48  ;;  %v2188_v36 = vadd.f32 %v2184_v30, %v3668_v57  ;;  %v2193_v19 = vsel %vm2137_vm2, %v2191_v6, %v2192_v32 }
 0x1bb   :  { %v2196_v51 = vsel %vm2137_vm2, %v2192_v32, %v2189_v55 }
 0x1bc   :  { %v2211_v20 = vadd.f32 %v2207_v28, %v2198_v18  ;;  %v2199_v21 = vadd.f32 %v2193_v19, %v2187_v43  ;;  %v2200_v22 = vadd.f32 %v2196_v51, %v2188_v36 }
 0x1be   :  { %v2217_v26 = vsel %vm2215_vm8, %v2211_v20, -inf  ;;  %v2212_v27 = vadd.f32 %v2206_v16, %v2199_v21  ;;  %v2213_v29 = vadd.f32 %v2209_v17, %v2200_v22 }
 0x1bf   :  { %v2220_v31 = vmax.f32 %v2210_v5, %v2217_v26 }
 0x1c0   :  { %v2219_v33 = vsel %vm2215_vm8, %v2213_v29, -inf }
 0x1c1   :  { %v2221_v34 = vrot.slane %v2220_v31, 4  ;;  %v2227_v48 = vmax.f32 %v2212_v27, %v2219_v33 }
 0x1c3   :  { %v2222_v35 = vmax.f32 %v2220_v31, %v2221_v34  ;;  %v2228_v57 = vrot.slane %v2227_v48, 4 }
 0x1c5   :  { %v2223_v37 = vrot.slane %v2222_v35, 2  ;;  %v2229_v38 = vmax.f32 %v2227_v48, %v2228_v57 }
 0x1c7   :  { %v2230_v39 = vrot.slane %v2229_v38, 2  ;;  %v2224_v40 = vmax.f32 %v2222_v35, %v2223_v37 }
 0x1c9   :  { %v2225_v41 = vrot.slane %v2224_v40, 1  ;;  %v2231_v44 = vmax.f32 %v2229_v38, %v2230_v39 }
 0x1cb   :  { %v2226_v45 = vmax.f32 %v2224_v40, %v2225_v41  ;;  %v2232_v46 = vrot.slane %v2231_v44, 1 }
 0x1cd   :  { %v2233_v50 = vmax.f32 %v2231_v44, %v2232_v46  ;;  %v2241_v52 = vadd.f32 %v2887_v47, %v2226_v45 }
 0x1cf   :  { %v2242_v53 = vadd.f32 %v2887_v47, %v2233_v50  ;;  %v2243_v56 = vmax.f32 %v2241_v52, 0.0 }
 0x1d1   :  { %v2244_v55 = vmax.f32 %v2242_v53, 0.0 }
 0x1d3   :  { %v2333_v58 = vrot.slane %v2244_v55, 7 }
 0x1d5   :  { %v2334_v59 = vsel %vm2328_vm5, %v2333_v58, %v2243_v56 }
 0x1d6   :  { %v2342_v60 = vpack.c.bf16 %v2334_v59, %v2334_v59 }
 0x1d8   :  { %2575 = vmatprep.mubr.bf16.mxu0 %v2342_v60 }
 0x1d9   :  { %2576 = vmatmul.mubr.bf16.vlgmr.msra.gmra.mrb[24].mxu0 %v2341_v61 }
 0x1fc   :  { %v1992_v62 = vpop.f32.mrb[16].mxu0  ;;  %v2098_v63 = vpop.f32.mrb[16].mxu1 }
 0x1fd   :  { %v1994_v0 = vpop.f32.mrb[17].mxu0  ;;  %v2100_v1 = vpop.f32.mrb[17].mxu1  ;;  %v2245_v5 = vrot.slane %v1992_v62, 1  ;;  %v2269_v6 = vrot.slane %v2098_v63, 3 }
 0x1fe   :  { %v1996_v2 = vpop.f32.mrb[18].mxu0  ;;  %v2102_v3 = vpop.f32.mrb[18].mxu1  ;;  %v2257_v10 = vrot.slane %v1994_v0, 2  ;;  %v2281_v13 = vrot.slane %v2100_v1, 4 }
 0x1ff   :  { %v2246_v7 = vrot.slane %v1996_v2, 1  ;;  %v2270_v8 = vrot.slane %v2102_v3, 3  ;;  %v1998_v9 = vpop.f32.mrb[19].mxu0  ;;  %v2104_v28 = vpop.f32.mrb[19].mxu1 }
 0x200   :  { %v2258_v23 = vrot.slane %v1998_v9, 2  ;;  %v2282_v25 = vrot.slane %v2104_v28, 4 }
 0x201   :  { %v2251_v12 = vsel %vm2124_vm3, %v2245_v5, %v2246_v7  ;;  %v2275_v14 = vsel %vm2205_vm7, %v2269_v6, %v2270_v8 }
 0x202   :  { %v2253_v32 = vadd.f32 %v2251_v12, %v3687_v42  ;;  %v2263_v15 = vsel %vm2137_vm2, %v2257_v10, %v2258_v23  ;;  %v2288_v30 = vsel %vm2285_vm9, %v2281_v13, %v2282_v25 }
 0x204   :  { %v2265_v16 = vadd.f32 %v2263_v15, %v2253_v32  ;;  %v2002_v17 = vpop.f32.mrb[20].mxu0  ;;  %v2108_v18 = vpop.f32.mrb[20].mxu1 }
 0x205   :  { %v2247_v43 = vrot.slane %v2002_v17, 1  ;;  %v2271_v36 = vrot.slane %v2108_v18, 3  ;;  %v2004_v19 = vpop.f32.mrb[21].mxu0  ;;  %v2110_v51 = vpop.f32.mrb[21].mxu1 }
 0x206   :  { %v2277_v20 = vadd.f32 %v2275_v14, %v2265_v16  ;;  %v2259_v21 = vrot.slane %v2004_v19, 2  ;;  %v2283_v22 = vrot.slane %v2110_v51, 4  ;;  %v2006_v26 = vpop.f32.mrb[22].mxu0  ;;  %v2112_v27 = vpop.f32.mrb[22].mxu1 }
 0x207   :  { %v2250_v42 = vsel %vm2124_vm3, %v2246_v7, %v2247_v43  ;;  %v2274_v29 = vsel %vm2205_vm7, %v2270_v8, %v2271_v36  ;;  %v2248_v31 = vrot.slane %v2006_v26, 1  ;;  %v2272_v33 = vrot.slane %v2112_v27, 3  ;;  %v2008_v34 = vpop.f32.mrb[23].mxu0  ;;  %v2114_v48 = vpop.f32.mrb[23].mxu1 }
 0x208   :  { %v2290_v35 = vadd.f32 %v2288_v30, %v2277_v20  ;;  %v2254_v57 = vadd.f32 %v2250_v42, %v3690_v54  ;;  %v2262_v37 = vsel %vm2137_vm2, %v2258_v23, %v2259_v21  ;;  %v2287_v38 = vsel %vm2285_vm9, %v2282_v25, %v2283_v22  ;;  %v2888_v25 = vld [vmem:[%s3790_s2 + $0x2] ss:$0 sm:$0xff]  ;;  %s3498_s2 = smov [#allocation8]  }
 0x209   :  { %v2249_v39 = vsel %vm2124_vm3, %v2247_v43, %v2248_v31  ;;  %v2252_v40 = vsel %vm2124_vm3, %v2248_v31, %v2245_v5  ;;  %v2273_v41 = vsel %vm2205_vm7, %v2271_v36, %v2272_v33  ;;  %v2276_v44 = vsel %vm2205_vm7, %v2272_v33, %v2269_v6  ;;  %s2630_s15 = sshll.u32 %s3498_s2, 4  ;;  %s2631_s15 = int_to_ptr.vmem [resolvable:$true] %s2630_s15 }
 0x20a   :  { %v2266_v45 = vadd.f32 %v2262_v37, %v2254_v57  ;;  %v2255_v54 = vadd.f32 %v2249_v39, %v3699_v4  ;;  %v2256_v46 = vadd.f32 %v2252_v40, %v3705_v11  ;;  %v2260_v47 = vrot.slane %v2008_v34, 2  ;;  %s3458_s16 = scalar_lea.vmem %s2631_s15, 32  ;;  %p3463_p11 = scmp.lt.s32.totalorder %s2631_s15, %s2631_s15 }
 0x20b   :  { %v2284_v50 = vrot.slane %v2114_v48, 4  ;;  %p3459_p10 = scmp.ne.s32.totalorder %s2631_s15, %s3458_s16  ;;  %p3464_p12 = scmp.lt.s32.totalorder %s3458_s16, %s3458_s16 }
 0x20c   :  { %v2278_v52 = vadd.f32 %v2274_v29, %v2266_v45  ;;  %v2261_v53 = vsel %vm2137_vm2, %v2259_v21, %v2260_v47  ;;  %v2264_v55 = vsel %vm2137_vm2, %v2260_v47, %v2257_v10  ;;  %v2889_v21 = vld [vmem:[%s3792_s4] ss:$0 sm:$0xff] }
 0x20d   :  { %v2267_v56 = vadd.f32 %v2261_v53, %v2255_v54  ;;  %v2268_v58 = vadd.f32 %v2264_v55, %v2256_v46  ;;  %v2286_v59 = vsel %vm2285_vm9, %v2283_v22, %v2284_v50  ;;  %v2289_v4 = vsel %vm2285_vm9, %v2284_v50, %v2281_v13  ;;  %p3465_p13 = por %p3464_p12, %p3463_p11 }
 0x20e   :  { %v2291_v11 = vadd.f32 %v2287_v38, %v2278_v52 }
 0x20f   :  { %v2279_v60 = vadd.f32 %v2273_v41, %v2267_v56  ;;  %v2280_v61 = vadd.f32 %v2276_v44, %v2268_v58  ;;  %p3466_p0 = pnand %p3465_p13, %p3459_p10 }
 0x210   :  { %v2297_v62 = vsel %vm2295_vm10, %v2291_v11, -inf }
 0x211   :  { %v2300_v63 = vmax.f32 %v2290_v35, %v2297_v62  ;;  %v2292_v49 = vadd.f32 %v2286_v59, %v2279_v60  ;;  %v2293_v0 = vadd.f32 %v2289_v4, %v2280_v61 }
 0x213   :  { %v2301_v1 = vrot.slane %v2300_v63, 4  ;;  %v2299_v2 = vsel %vm2295_vm10, %v2293_v0, -inf }
 0x214   :  { %v2307_v3 = vmax.f32 %v2292_v49, %v2299_v2 }
 0x215   :  { %v2302_v5 = vmax.f32 %v2300_v63, %v2301_v1 }
 0x216   :  { %v2308_v6 = vrot.slane %v2307_v3, 4 }
 0x217   :  { %v2303_v7 = vrot.slane %v2302_v5, 2 }
 0x218   :  { %v2309_v8 = vmax.f32 %v2307_v3, %v2308_v6 }
 0x219   :  { %v2304_v9 = vmax.f32 %v2302_v5, %v2303_v7 }
 0x21a   :  { %v2310_v28 = vrot.slane %v2309_v8, 2 }
 0x21b   :  { %v2305_v10 = vrot.slane %v2304_v9, 1 }
 0x21c   :  { %v2311_v23 = vmax.f32 %v2309_v8, %v2310_v28 }
 0x21d   :  { %v2306_v24 = vmax.f32 %v2304_v9, %v2305_v10 }
 0x21e   :  { %v2312_v13 = vrot.slane %v2311_v23, 1 }
 0x21f   :  { %v2321_v14 = vadd.f32 %v2888_v25, %v2306_v24 }
 0x220   :  { %v2313_v12 = vmax.f32 %v2311_v23, %v2312_v13 }
 0x221   :  { %v2323_v30 = vmax.f32 %v2321_v14, 0.0 }
 0x222   :  { %v2322_v32 = vadd.f32 %v2888_v25, %v2313_v12 }
 0x224   :  { %v2324_v15 = vmax.f32 %v2322_v32, 0.0 }
 0x226   :  { %v2338_v16 = vrot.slane %v2324_v15, 7 }
 0x228   :  { %v2339_v17 = vsel %vm2328_vm5, %v2338_v16, %v2323_v30 }
 0x229   :  { %v2343_v18 = vpack.c.bf16 %v2339_v17, %v2339_v17 }
 0x22b   :  { %2962 = vmatmul.mubr.bf16.vlgmr.msra.gmra.mrb[24].mxu1 %v2343_v18 }
 0x2ac   :  { %v2930_v43 = vpop.f32.mrb[24].mxu0 }
 0x2ad   :  { %v2931_v36 = vpop.f32.mrb[25].mxu0 }
 0x2ae   :  { %v2932_v19 = vadd.f32 %v2931_v36, %v2930_v43  ;;  %v2933_v51 = vpop.f32.mrb[26].mxu0 }
 0x2af   :  { %v2934_v20 = vpop.f32.mrb[27].mxu0 }
 0x2b0   :  { %v2578_v22 = vadd.f32 %v2932_v19, %v2889_v21 }
 0x2fe   :  { %v2617_v26 = vpop.f32.mrb[24].mxu1 }
 0x2ff   :  { %v2618_v27 = vadd.f32 %v2617_v26, %v2578_v22  ;;  %v2963_v42 = vpop.f32.mrb[25].mxu1 }
 0x300   :  { %v2620_v29 = vpop.f32.mrb[26].mxu1 }
 0x301   :  { %2623 = vst [vmem:[#allocation8] sm:$0x3] %v2618_v27  ;;  %v2964_v31 = vpop.f32.mrb[27].mxu1 }
 0x302   :  { %3469 = shalt.err (!%p3466_p0)
}
 0x303   :  { %s3470_s4 = scalar_lea.hbm %s3793_s5, 32 }
 0x304   :  { %p3471_p1 = scmp.ne.s32.totalorder %s3793_s5, %s3470_s4  ;;  %p3474_p2 = scmp.lt.u32.totalorder %s3470_s4, %s3793_s5 }
 0x306   :  { %p3476_p3 = pnand %p3474_p2, %p3471_p1 }
 0x308   :  { %3479 = shalt.err (!%p3476_p3)
}
 0x309   :  { %2633 = dma.vmem_to_hbm [thread:$0]  %s2631_s15, 32, %s3793_s5, [#allocation4]  }
 0x30a   :  { %3484 = dma.done.wait [#allocation4], 32  }
 0x30b   :  { %3485 = vsyncadd [#allocation4], 4294967264 }
 0x30c   :  { %2637 = vsyncpa [#allocation3], 1 }
 0x30d   :  { %2638 = vsyncpa [#allocation6], 1 }
 0x30e   :  { %2639 = vsyncpa [#allocation4], 1 }

</bundles_post_ra>
